<compile_context>
chip_gen: v6e
topology: v6e:2x2x1
jax: 0.10.0
libtpu: 0.0.40
codegen_flags: <defaults>
</compile_context>

<pallas_src>
import functools

import jax
import jax.numpy as jnp
from jax.experimental import pallas as pl
from jax.experimental.pallas import tpu as pltpu

SMAX = "on"  # mirrors the global `smax` flag of the original script


# ------------------------------------------------------------------ kernel 1: LSTM recurrence
def _lstm_recurrence_kernel(gx_ref, whh_ref, hs_ref, hN_ref, cN_ref, *, t_chunk):
    """One grid step == one chunk of `t_chunk` time steps.

    gx_ref : (t_chunk, B, 4H) f32   precomputed x_t @ W_ih^T + (b_ih + b_hh)
    whh_ref: (H, 4H)          bf16  W_hh^T (VMEM-resident across the whole grid)
    hs_ref : (t_chunk, B, H)  bf16  per-step hidden states (fed to the Linear kernel)
    hN_ref : (B, H)           f32   resident carry / final h_n
    cN_ref : (B, H)           f32   resident carry / final c_n
    """
    H = hN_ref.shape[-1]

    @pl.when(pl.program_id(0) == 0)
    def _():  # hidden=None -> zero initial state
        hN_ref[...] = jnp.zeros_like(hN_ref)
        cN_ref[...] = jnp.zeros_like(cN_ref)

    whh = whh_ref[...]  # hoisted out of the loop

    def step(t, carry):
        h, c = carry
        # gates_x[t] was precomputed outside the recurrence; only the recurrent matmul
        # (B,H)x(H,4H) remains on the latency-critical path.
        gates = gx_ref[t] + jnp.dot(h.astype(whh.dtype), whh,
                                    preferred_element_type=jnp.float32)
        # NOTE: gate slices are lane-aligned (free) whenever H % 128 == 0.
        i_g = jax.nn.sigmoid(gates[:, 0 * H:1 * H])
        f_g = jax.nn.sigmoid(gates[:, 1 * H:2 * H])
        g_g = jnp.tanh(gates[:, 2 * H:3 * H])
        o_g = jax.nn.sigmoid(gates[:, 3 * H:4 * H])
        c_new = f_g * c + i_g * g_g
        h_new = o_g * jnp.tanh(c_new)
        hs_ref[t] = h_new.astype(hs_ref.dtype)   # bf16 store (consumed by a bf16 matmul)
        return h_new, c_new

    h_fin, c_fin = jax.lax.fori_loop(
        0, t_chunk, step, (hN_ref[...], cN_ref[...]), unroll=True)

    hN_ref[...] = h_fin
    cN_ref[...] = c_fin


# ------------------------------------------------------- kernel 2: fused Linear (+ Softmax dim=1)
def _linear_softmax_kernel(hs_ref, wlin_ref, blin_ref, out_ref, *, apply_softmax):
    """One grid step == (one batch row, one vocab tile).

    logits = h @ W_lin^T + b; softmax over the time axis (dim=1 of the (B,T,V) output),
    which is independent per vocab column, so V-tiling is safe.
    """
    h = hs_ref[0]                                            # (T, H) bf16
    logits = (jnp.dot(h.astype(wlin_ref.dtype), wlin_ref[...],
                      preferred_element_type=jnp.float32)
              + blin_ref[...])                               # (T, tv) f32
    if apply_softmax:
        m = jnp.max(logits, axis=0, keepdims=True)           # softmax over T
        e = jnp.exp(logits - m)
        logits = e * pl.reciprocal(jnp.sum(e, axis=0, keepdims=True), approx=True)
    out_ref[0] = logits


# ----------------------------------------------------------------------------------- wrapper
def _largest_divisor(n, cap):
    c = min(n, cap)
    while n % c:
        c -= 1
    return c


def _lane_tile(v, cap=512):
    """Largest lane-aligned (multiple-of-128) divisor of v that is <= cap, else full v."""
    if v <= cap or v % 128 != 0:
        return v
    t = cap - (cap % 128)
    while t > 0 and v % t:
        t -= 128
    return t if t > 0 else v


@functools.partial(jax.jit, static_argnames=("smax",))
def gerador_forward(params, tokens, smax=SMAX):
    B, T = tokens.shape
    emb_table = params["embedding"]                          # (input_dim, E)
    E = emb_table.shape[1]
    H = params["w_hh"].shape[1]                              # w_hh: (4H, H)
    V = params["w_lin"].shape[0]                             # w_lin: (V, H)

    # --- XLA glue: time-major embedding gather + hoisted input projection (one big matmul) ---
    emb_t = jnp.take(emb_table, tokens.T, axis=0)            # (T, B, E) — no big transpose
    b_gate = (params["b_ih"] + params["b_hh"]).reshape(1, 4 * H)
    gates_x = (jnp.dot(emb_t.reshape(T * B, E), params["w_ih"].T)
               + b_gate).reshape(T, B, 4 * H)                # (T, B, 4H) f32
    # TODO(synk): the gather + input projection could be fused into the Pallas kernel via
    # scalar prefetch (pl.Element row indexing of the embedding table); kept as XLA glue here.

    whh_t = params["w_hh"].T.astype(jnp.bfloat16)            # (H, 4H)  bf16 matmul operand
    wlin_t = params["w_lin"].T.astype(jnp.bfloat16)          # (H, V)   bf16 matmul operand
    blin = params["b_lin"].reshape(1, V).astype(jnp.float32)

    # --- Pallas kernel 1: serial LSTM recurrence, T-chunked grid + in-kernel unrolled loop ---
    t_chunk = _largest_divisor(T, 64)
    n_chunks = T // t_chunk
    hs_tb, h_n, c_n = pl.pallas_call(
        functools.partial(_lstm_recurrence_kernel, t_chunk=t_chunk),
        grid=(n_chunks,),
        in_specs=[
            pl.BlockSpec((t_chunk, B, 4 * H), lambda k: (k, 0, 0)),   # gates_x chunk
            pl.BlockSpec((H, 4 * H), lambda k: (0, 0)),               # W_hh^T (resident)
        ],
        out_specs=(
            pl.BlockSpec((t_chunk, B, H), lambda k: (k, 0, 0)),       # h_t sequence (bf16)
            pl.BlockSpec((B, H), lambda k: (0, 0)),                   # h carry -> h_n
            pl.BlockSpec((B, H), lambda k: (0, 0)),                   # c carry -> c_n
        ),
        out_shape=(
            jax.ShapeDtypeStruct((T, B, H), jnp.bfloat16),
            jax.ShapeDtypeStruct((B, H), jnp.float32),
            jax.ShapeDtypeStruct((B, H), jnp.float32),
        ),
        compiler_params=pltpu.CompilerParams(
            dimension_semantics=("arbitrary",)),             # time is a carried recurrence
    )(gates_x, whh_t)

    # Only remaining layout fix-up: (T,B,H) -> (B,T,H) in bf16.  H-sized, cheap vs B*T*V.
    hs_bt = jnp.transpose(hs_tb, (1, 0, 2))

    # --- Pallas kernel 2: fused Linear + Softmax(dim=1), parallel over (batch, vocab-tile) ---
    tv = _lane_tile(V)
    n_v = V // tv
    out = pl.pallas_call(
        functools.partial(_linear_softmax_kernel, apply_softmax=(smax == "on")),
        grid=(B, n_v),
        in_specs=[
            pl.BlockSpec((1, T, H), lambda b, vi: (b, 0, 0)),
            pl.BlockSpec((H, tv), lambda b, vi: (0, vi)),
            pl.BlockSpec((1, tv), lambda b, vi: (0, vi)),
        ],
        out_specs=pl.BlockSpec((1, T, tv), lambda b, vi: (b, 0, vi)),
        out_shape=jax.ShapeDtypeStruct((B, T, V), jnp.float32),
        compiler_params=pltpu.CompilerParams(
            dimension_semantics=("parallel", "parallel")),
    )(hs_bt, wlin_t, blin)

    hidden = (h_n[None, :, :], c_n[None, :, :])              # (1, B, H) each, like PyTorch
    return out, hidden


# --------------------------------------------------------------------- deterministic params
def init_params(key, input_dim, embedding_dim, hidden_dim, output_size):
    ks = jax.random.split(key, 7)
    k_lstm = 1.0 / jnp.sqrt(hidden_dim)
    k_lin = 1.0 / jnp.sqrt(hidden_dim)
    u = lambda k, shape, s: jax.random.uniform(k, shape, jnp.float32, -s, s)
    return {
        "embedding": jax.random.normal(ks[0], (input_dim, embedding_dim), jnp.float32),
        "w_ih": u(ks[1], (4 * hidden_dim, embedding_dim), k_lstm),
        "w_hh": u(ks[2], (4 * hidden_dim, hidden_dim), k_lstm),
        "b_ih": u(ks[3], (4 * hidden_dim,), k_lstm),
        "b_hh": u(ks[4], (4 * hidden_dim,), k_lstm),
        "w_lin": u(ks[5], (output_size, hidden_dim), k_lin),
        "b_lin": u(ks[6], (output_size,), k_lin),
    }


# ----------------------------------------------------------------------------- pure-JAX ref
def gerador_reference(params, tokens, smax=SMAX):
    emb = jnp.take(params["embedding"], tokens, axis=0)      # (B, T, E)
    H = params["w_hh"].shape[1]
    B = tokens.shape[0]

    def step(carry, x_t):
        h, c = carry
        gates = (x_t @ params["w_ih"].T + params["b_ih"]
                 + h @ params["w_hh"].T + params["b_hh"])
        i = jax.nn.sigmoid(gates[:, 0 * H:1 * H])
        f = jax.nn.sigmoid(gates[:, 1 * H:2 * H])
        g = jnp.tanh(gates[:, 2 * H:3 * H])
        o = jax.nn.sigmoid(gates[:, 3 * H:4 * H])
        c = f * c + i * g
        h = o * jnp.tanh(c)
        return (h, c), h

    h0 = jnp.zeros((B, H), jnp.float32)
    (hN, cN), hs = jax.lax.scan(step, (h0, h0), jnp.transpose(emb, (1, 0, 2)))
    out = jnp.transpose(hs, (1, 0, 2)) @ params["w_lin"].T + params["b_lin"]
    if smax == "on":
        out = jax.nn.softmax(out, axis=1)
    return out, (hN[None], cN[None])


if __name__ == "__main__":
    # small shapes consistent with the module
    input_dim, embedding_dim, hidden_dim, output_size = 16, 32, 32, 16
    B, T = 2, 8

    key = jax.random.PRNGKey(0)
    k_param, k_tok = jax.random.split(key)
    params = init_params(k_param, input_dim, embedding_dim, hidden_dim, output_size)
    tokens = jax.random.randint(k_tok, (B, T), 0, input_dim, dtype=jnp.int32)

    out, (h_n, c_n) = gerador_forward(params, tokens)
    jax.block_until_ready((out, h_n, c_n))

    # sanity check against the pure-JAX reference
    out_ref, (h_ref, c_ref) = gerador_reference(params, tokens)
    assert out.shape == (B, T, output_size)
    assert h_n.shape == (1, B, hidden_dim) and c_n.shape == (1, B, hidden_dim)
    assert jnp.max(jnp.abs(out - out_ref)) < 5e-2
    assert jnp.max(jnp.abs(h_n - h_ref)) < 5e-2
    assert jnp.max(jnp.abs(c_n - c_ref)) < 5e-2

    print("KERNEL_OK")
</pallas_src>

<mosaic_0001>
module attributes {stable_mosaic.version = 11 : i64} {
  func.func @_lstm_recurrence_kernel(%arg0: i32, %arg1: memref<8x2x128xf32, #tpu.memory_space<vmem>>, %arg2: memref<32x128xbf16, #tpu.memory_space<vmem>>, %arg3: memref<8x2x32xbf16, #tpu.memory_space<vmem>>, %arg4: memref<2x32xf32, #tpu.memory_space<vmem>>, %arg5: memref<2x32xf32, #tpu.memory_space<vmem>>) attributes {dimension_semantics = [#tpu.dimension_semantics<arbitrary>], iteration_bounds = array<i64: 1>, scalar_prefetch = 0 : i64, scratch_operands = 0 : i64, tpu.core_type = #tpu.core_type<tc>, window_params = [{transform_indices = @transform_0, window_bounds = array<i64: 8, 2, 128>}, {pipeline_mode = #tpu.pipeline_mode<synchronous>, transform_indices = @transform_1, window_bounds = array<i64: 32, 128>}, {transform_indices = @transform_2, window_bounds = array<i64: 8, 2, 32>}, {pipeline_mode = #tpu.pipeline_mode<synchronous>, transform_indices = @transform_3, window_bounds = array<i64: 2, 32>}, {pipeline_mode = #tpu.pipeline_mode<synchronous>, transform_indices = @transform_4, window_bounds = array<i64: 2, 32>}]} {
    %c0_i32 = arith.constant 0 : i32
    %0 = arith.cmpi eq, %arg0, %c0_i32 : i32
    %1 = arith.extui %0 : i1 to i32
    %c0_i32_0 = arith.constant 0 : i32
    %2 = arith.cmpi ne, %1, %c0_i32_0 : i32
    scf.if %2 {
      %cst_74 = arith.constant 0.000000e+00 : f32
      %296 = vector.broadcast %cst_74 : f32 to vector<2x32xf32>
      %c0_75 = arith.constant 0 : index
      %c0_76 = arith.constant 0 : index
      %297 = vector.load %arg4[%c0_75, %c0_76] : memref<2x32xf32, #tpu.memory_space<vmem>>, vector<2x32xf32>
      tpu.vector_store %arg4[%c0_75, %c0_76], %296 {strides = array<i32>} : memref<2x32xf32, #tpu.memory_space<vmem>>, vector<2x32xf32>,
      %cst_77 = arith.constant 0.000000e+00 : f32
      %298 = vector.broadcast %cst_77 : f32 to vector<2x32xf32>
      %c0_78 = arith.constant 0 : index
      %c0_79 = arith.constant 0 : index
      %299 = vector.load %arg5[%c0_78, %c0_79] : memref<2x32xf32, #tpu.memory_space<vmem>>, vector<2x32xf32>
      tpu.vector_store %arg5[%c0_78, %c0_79], %298 {strides = array<i32>} : memref<2x32xf32, #tpu.memory_space<vmem>>, vector<2x32xf32>,
    } else {
    }
    %c0 = arith.constant 0 : index
    %c0_1 = arith.constant 0 : index
    %3 = vector.load %arg2[%c0, %c0_1] : memref<32x128xbf16, #tpu.memory_space<vmem>>, vector<32x128xbf16>
    %c0_2 = arith.constant 0 : index
    %c0_3 = arith.constant 0 : index
    %4 = vector.load %arg4[%c0_2, %c0_3] : memref<2x32xf32, #tpu.memory_space<vmem>>, vector<2x32xf32>
    %c0_4 = arith.constant 0 : index
    %c0_5 = arith.constant 0 : index
    %5 = vector.load %arg5[%c0_4, %c0_5] : memref<2x32xf32, #tpu.memory_space<vmem>>, vector<2x32xf32>
    %c0_i32_6 = arith.constant 0 : i32
    %6 = arith.index_cast %c0_i32_6 : i32 to index
    %c0_7 = arith.constant 0 : index
    %c0_8 = arith.constant 0 : index
    %7 = vector.load %arg1[%6, %c0_7, %c0_8] : memref<8x2x128xf32, #tpu.memory_space<vmem>>, vector<1x2x128xf32>
    %8 = vector.shape_cast %7 : vector<1x2x128xf32> to vector<2x128xf32>
    %9 = arith.truncf %4 : vector<2x32xf32> to vector<2x32xbf16>
    %cst = arith.constant dense<0.000000e+00> : vector<2x128xf32>
    %10 = tpu.matmul %9, %3, %cst {dimension_numbers = #tpu.dot_dimension_numbers<[1], [0], [0], [1], [0, 0, 1, 1], [], []>} : vector<2x32xbf16>, vector<32x128xbf16>, vector<2x128xf32> -> vector<2x128xf32>
    %11 = arith.addf %8, %10 : vector<2x128xf32>
    %12 = vector.extract_strided_slice %11 {offsets = [0, 0], sizes = [2, 32], strides = [1, 1]} : vector<2x128xf32> to vector<2x32xf32>
    %13 = arith.negf %12 : vector<2x32xf32>
    %14 = math.exp %13 : vector<2x32xf32>
    %cst_9 = arith.constant 1.000000e+00 : f32
    %15 = vector.broadcast %cst_9 : f32 to vector<2x32xf32>
    %16 = arith.addf %15, %14 : vector<2x32xf32>
    %17 = arith.divf %15, %16 : vector<2x32xf32>
    %18 = vector.extract_strided_slice %11 {offsets = [0, 32], sizes = [2, 32], strides = [1, 1]} : vector<2x128xf32> to vector<2x32xf32>
    %19 = arith.negf %18 : vector<2x32xf32>
    %20 = math.exp %19 : vector<2x32xf32>
    %cst_10 = arith.constant 1.000000e+00 : f32
    %21 = vector.broadcast %cst_10 : f32 to vector<2x32xf32>
    %22 = arith.addf %21, %20 : vector<2x32xf32>
    %23 = arith.divf %21, %22 : vector<2x32xf32>
    %24 = vector.extract_strided_slice %11 {offsets = [0, 64], sizes = [2, 32], strides = [1, 1]} : vector<2x128xf32> to vector<2x32xf32>
    %25 = math.tanh %24 : vector<2x32xf32>
    %26 = vector.extract_strided_slice %11 {offsets = [0, 96], sizes = [2, 32], strides = [1, 1]} : vector<2x128xf32> to vector<2x32xf32>
    %27 = arith.negf %26 : vector<2x32xf32>
    %28 = math.exp %27 : vector<2x32xf32>
    %cst_11 = arith.constant 1.000000e+00 : f32
    %29 = vector.broadcast %cst_11 : f32 to vector<2x32xf32>
    %30 = arith.addf %29, %28 : vector<2x32xf32>
    %31 = arith.divf %29, %30 : vector<2x32xf32>
    %32 = arith.mulf %23, %5 : vector<2x32xf32>
    %33 = arith.mulf %17, %25 : vector<2x32xf32>
    %34 = arith.addf %32, %33 : vector<2x32xf32>
    %35 = math.tanh %34 : vector<2x32xf32>
    %36 = arith.mulf %31, %35 : vector<2x32xf32>
    %37 = arith.truncf %36 : vector<2x32xf32> to vector<2x32xbf16>
    %38 = arith.index_cast %c0_i32_6 : i32 to index
    %c0_12 = arith.constant 0 : index
    %c0_13 = arith.constant 0 : index
    %39 = vector.load %arg3[%38, %c0_12, %c0_13] : memref<8x2x32xbf16, #tpu.memory_space<vmem>>, vector<1x2x32xbf16>
    %40 = vector.shape_cast %39 : vector<1x2x32xbf16> to vector<2x32xbf16>
    %41 = vector.shape_cast %37 : vector<2x32xbf16> to vector<1x2x32xbf16>
    tpu.vector_store %arg3[%38, %c0_12, %c0_13], %41 {strides = array<i32>} : memref<8x2x32xbf16, #tpu.memory_space<vmem>>, vector<1x2x32xbf16>,
    %c1_i32 = arith.constant 1 : i32
    %42 = arith.index_cast %c1_i32 : i32 to index
    %c0_14 = arith.constant 0 : index
    %c0_15 = arith.constant 0 : index
    %43 = vector.load %arg1[%42, %c0_14, %c0_15] : memref<8x2x128xf32, #tpu.memory_space<vmem>>, vector<1x2x128xf32>
    %44 = vector.shape_cast %43 : vector<1x2x128xf32> to vector<2x128xf32>
    %45 = arith.truncf %36 : vector<2x32xf32> to vector<2x32xbf16>
    %cst_16 = arith.constant dense<0.000000e+00> : vector<2x128xf32>
    %46 = tpu.matmul %45, %3, %cst_16 {dimension_numbers = #tpu.dot_dimension_numbers<[1], [0], [0], [1], [0, 0, 1, 1], [], []>} : vector<2x32xbf16>, vector<32x128xbf16>, vector<2x128xf32> -> vector<2x128xf32>
    %47 = arith.addf %44, %46 : vector<2x128xf32>
    %48 = vector.extract_strided_slice %47 {offsets = [0, 0], sizes = [2, 32], strides = [1, 1]} : vector<2x128xf32> to vector<2x32xf32>
    %49 = arith.negf %48 : vector<2x32xf32>
    %50 = math.exp %49 : vector<2x32xf32>
    %cst_17 = arith.constant 1.000000e+00 : f32
    %51 = vector.broadcast %cst_17 : f32 to vector<2x32xf32>
    %52 = arith.addf %51, %50 : vector<2x32xf32>
    %53 = arith.divf %51, %52 : vector<2x32xf32>
    %54 = vector.extract_strided_slice %47 {offsets = [0, 32], sizes = [2, 32], strides = [1, 1]} : vector<2x128xf32> to vector<2x32xf32>
    %55 = arith.negf %54 : vector<2x32xf32>
    %56 = math.exp %55 : vector<2x32xf32>
    %cst_18 = arith.constant 1.000000e+00 : f32
    %57 = vector.broadcast %cst_18 : f32 to vector<2x32xf32>
    %58 = arith.addf %57, %56 : vector<2x32xf32>
    %59 = arith.divf %57, %58 : vector<2x32xf32>
    %60 = vector.extract_strided_slice %47 {offsets = [0, 64], sizes = [2, 32], strides = [1, 1]} : vector<2x128xf32> to vector<2x32xf32>
    %61 = math.tanh %60 : vector<2x32xf32>
    %62 = vector.extract_strided_slice %47 {offsets = [0, 96], sizes = [2, 32], strides = [1, 1]} : vector<2x128xf32> to vector<2x32xf32>
    %63 = arith.negf %62 : vector<2x32xf32>
    %64 = math.exp %63 : vector<2x32xf32>
    %cst_19 = arith.constant 1.000000e+00 : f32
    %65 = vector.broadcast %cst_19 : f32 to vector<2x32xf32>
    %66 = arith.addf %65, %64 : vector<2x32xf32>
    %67 = arith.divf %65, %66 : vector<2x32xf32>
    %68 = arith.mulf %59, %34 : vector<2x32xf32>
    %69 = arith.mulf %53, %61 : vector<2x32xf32>
    %70 = arith.addf %68, %69 : vector<2x32xf32>
    %71 = math.tanh %70 : vector<2x32xf32>
    %72 = arith.mulf %67, %71 : vector<2x32xf32>
    %73 = arith.truncf %72 : vector<2x32xf32> to vector<2x32xbf16>
    %74 = arith.index_cast %c1_i32 : i32 to index
    %c0_20 = arith.constant 0 : index
    %c0_21 = arith.constant 0 : index
    %75 = vector.load %arg3[%74, %c0_20, %c0_21] : memref<8x2x32xbf16, #tpu.memory_space<vmem>>, vector<1x2x32xbf16>
    %76 = vector.shape_cast %75 : vector<1x2x32xbf16> to vector<2x32xbf16>
    %77 = vector.shape_cast %73 : vector<2x32xbf16> to vector<1x2x32xbf16>
    tpu.vector_store %arg3[%74, %c0_20, %c0_21], %77 {strides = array<i32>} : memref<8x2x32xbf16, #tpu.memory_space<vmem>>, vector<1x2x32xbf16>,
    %c2_i32 = arith.constant 2 : i32
    %78 = arith.index_cast %c2_i32 : i32 to index
    %c0_22 = arith.constant 0 : index
    %c0_23 = arith.constant 0 : index
    %79 = vector.load %arg1[%78, %c0_22, %c0_23] : memref<8x2x128xf32, #tpu.memory_space<vmem>>, vector<1x2x128xf32>
    %80 = vector.shape_cast %79 : vector<1x2x128xf32> to vector<2x128xf32>
    %81 = arith.truncf %72 : vector<2x32xf32> to vector<2x32xbf16>
    %cst_24 = arith.constant dense<0.000000e+00> : vector<2x128xf32>
    %82 = tpu.matmul %81, %3, %cst_24 {dimension_numbers = #tpu.dot_dimension_numbers<[1], [0], [0], [1], [0, 0, 1, 1], [], []>} : vector<2x32xbf16>, vector<32x128xbf16>, vector<2x128xf32> -> vector<2x128xf32>
    %83 = arith.addf %80, %82 : vector<2x128xf32>
    %84 = vector.extract_strided_slice %83 {offsets = [0, 0], sizes = [2, 32], strides = [1, 1]} : vector<2x128xf32> to vector<2x32xf32>
    %85 = arith.negf %84 : vector<2x32xf32>
    %86 = math.exp %85 : vector<2x32xf32>
    %cst_25 = arith.constant 1.000000e+00 : f32
    %87 = vector.broadcast %cst_25 : f32 to vector<2x32xf32>
    %88 = arith.addf %87, %86 : vector<2x32xf32>
    %89 = arith.divf %87, %88 : vector<2x32xf32>
    %90 = vector.extract_strided_slice %83 {offsets = [0, 32], sizes = [2, 32], strides = [1, 1]} : vector<2x128xf32> to vector<2x32xf32>
    %91 = arith.negf %90 : vector<2x32xf32>
    %92 = math.exp %91 : vector<2x32xf32>
    %cst_26 = arith.constant 1.000000e+00 : f32
    %93 = vector.broadcast %cst_26 : f32 to vector<2x32xf32>
    %94 = arith.addf %93, %92 : vector<2x32xf32>
    %95 = arith.divf %93, %94 : vector<2x32xf32>
    %96 = vector.extract_strided_slice %83 {offsets = [0, 64], sizes = [2, 32], strides = [1, 1]} : vector<2x128xf32> to vector<2x32xf32>
    %97 = math.tanh %96 : vector<2x32xf32>
    %98 = vector.extract_strided_slice %83 {offsets = [0, 96], sizes = [2, 32], strides = [1, 1]} : vector<2x128xf32> to vector<2x32xf32>
    %99 = arith.negf %98 : vector<2x32xf32>
    %100 = math.exp %99 : vector<2x32xf32>
    %cst_27 = arith.constant 1.000000e+00 : f32
    %101 = vector.broadcast %cst_27 : f32 to vector<2x32xf32>
    %102 = arith.addf %101, %100 : vector<2x32xf32>
    %103 = arith.divf %101, %102 : vector<2x32xf32>
    %104 = arith.mulf %95, %70 : vector<2x32xf32>
    %105 = arith.mulf %89, %97 : vector<2x32xf32>
    %106 = arith.addf %104, %105 : vector<2x32xf32>
    %107 = math.tanh %106 : vector<2x32xf32>
    %108 = arith.mulf %103, %107 : vector<2x32xf32>
    %109 = arith.truncf %108 : vector<2x32xf32> to vector<2x32xbf16>
    %110 = arith.index_cast %c2_i32 : i32 to index
    %c0_28 = arith.constant 0 : index
    %c0_29 = arith.constant 0 : index
    %111 = vector.load %arg3[%110, %c0_28, %c0_29] : memref<8x2x32xbf16, #tpu.memory_space<vmem>>, vector<1x2x32xbf16>
    %112 = vector.shape_cast %111 : vector<1x2x32xbf16> to vector<2x32xbf16>
    %113 = vector.shape_cast %109 : vector<2x32xbf16> to vector<1x2x32xbf16>
    tpu.vector_store %arg3[%110, %c0_28, %c0_29], %113 {strides = array<i32>} : memref<8x2x32xbf16, #tpu.memory_space<vmem>>, vector<1x2x32xbf16>,
    %c3_i32 = arith.constant 3 : i32
    %114 = arith.index_cast %c3_i32 : i32 to index
    %c0_30 = arith.constant 0 : index
    %c0_31 = arith.constant 0 : index
    %115 = vector.load %arg1[%114, %c0_30, %c0_31] : memref<8x2x128xf32, #tpu.memory_space<vmem>>, vector<1x2x128xf32>
    %116 = vector.shape_cast %115 : vector<1x2x128xf32> to vector<2x128xf32>
    %117 = arith.truncf %108 : vector<2x32xf32> to vector<2x32xbf16>
    %cst_32 = arith.constant dense<0.000000e+00> : vector<2x128xf32>
    %118 = tpu.matmul %117, %3, %cst_32 {dimension_numbers = #tpu.dot_dimension_numbers<[1], [0], [0], [1], [0, 0, 1, 1], [], []>} : vector<2x32xbf16>, vector<32x128xbf16>, vector<2x128xf32> -> vector<2x128xf32>
    %119 = arith.addf %116, %118 : vector<2x128xf32>
    %120 = vector.extract_strided_slice %119 {offsets = [0, 0], sizes = [2, 32], strides = [1, 1]} : vector<2x128xf32> to vector<2x32xf32>
    %121 = arith.negf %120 : vector<2x32xf32>
    %122 = math.exp %121 : vector<2x32xf32>
    %cst_33 = arith.constant 1.000000e+00 : f32
    %123 = vector.broadcast %cst_33 : f32 to vector<2x32xf32>
    %124 = arith.addf %123, %122 : vector<2x32xf32>
    %125 = arith.divf %123, %124 : vector<2x32xf32>
    %126 = vector.extract_strided_slice %119 {offsets = [0, 32], sizes = [2, 32], strides = [1, 1]} : vector<2x128xf32> to vector<2x32xf32>
    %127 = arith.negf %126 : vector<2x32xf32>
    %128 = math.exp %127 : vector<2x32xf32>
    %cst_34 = arith.constant 1.000000e+00 : f32
    %129 = vector.broadcast %cst_34 : f32 to vector<2x32xf32>
    %130 = arith.addf %129, %128 : vector<2x32xf32>
    %131 = arith.divf %129, %130 : vector<2x32xf32>
    %132 = vector.extract_strided_slice %119 {offsets = [0, 64], sizes = [2, 32], strides = [1, 1]} : vector<2x128xf32> to vector<2x32xf32>
    %133 = math.tanh %132 : vector<2x32xf32>
    %134 = vector.extract_strided_slice %119 {offsets = [0, 96], sizes = [2, 32], strides = [1, 1]} : vector<2x128xf32> to vector<2x32xf32>
    %135 = arith.negf %134 : vector<2x32xf32>
    %136 = math.exp %135 : vector<2x32xf32>
    %cst_35 = arith.constant 1.000000e+00 : f32
    %137 = vector.broadcast %cst_35 : f32 to vector<2x32xf32>
    %138 = arith.addf %137, %136 : vector<2x32xf32>
    %139 = arith.divf %137, %138 : vector<2x32xf32>
    %140 = arith.mulf %131, %106 : vector<2x32xf32>
    %141 = arith.mulf %125, %133 : vector<2x32xf32>
    %142 = arith.addf %140, %141 : vector<2x32xf32>
    %143 = math.tanh %142 : vector<2x32xf32>
    %144 = arith.mulf %139, %143 : vector<2x32xf32>
    %145 = arith.truncf %144 : vector<2x32xf32> to vector<2x32xbf16>
    %146 = arith.index_cast %c3_i32 : i32 to index
    %c0_36 = arith.constant 0 : index
    %c0_37 = arith.constant 0 : index
    %147 = vector.load %arg3[%146, %c0_36, %c0_37] : memref<8x2x32xbf16, #tpu.memory_space<vmem>>, vector<1x2x32xbf16>
    %148 = vector.shape_cast %147 : vector<1x2x32xbf16> to vector<2x32xbf16>
    %149 = vector.shape_cast %145 : vector<2x32xbf16> to vector<1x2x32xbf16>
    tpu.vector_store %arg3[%146, %c0_36, %c0_37], %149 {strides = array<i32>} : memref<8x2x32xbf16, #tpu.memory_space<vmem>>, vector<1x2x32xbf16>,
    %c4_i32 = arith.constant 4 : i32
    %150 = arith.index_cast %c4_i32 : i32 to index
    %c0_38 = arith.constant 0 : index
    %c0_39 = arith.constant 0 : index
    %151 = vector.load %arg1[%150, %c0_38, %c0_39] : memref<8x2x128xf32, #tpu.memory_space<vmem>>, vector<1x2x128xf32>
    %152 = vector.shape_cast %151 : vector<1x2x128xf32> to vector<2x128xf32>
    %153 = arith.truncf %144 : vector<2x32xf32> to vector<2x32xbf16>
    %cst_40 = arith.constant dense<0.000000e+00> : vector<2x128xf32>
    %154 = tpu.matmul %153, %3, %cst_40 {dimension_numbers = #tpu.dot_dimension_numbers<[1], [0], [0], [1], [0, 0, 1, 1], [], []>} : vector<2x32xbf16>, vector<32x128xbf16>, vector<2x128xf32> -> vector<2x128xf32>
    %155 = arith.addf %152, %154 : vector<2x128xf32>
    %156 = vector.extract_strided_slice %155 {offsets = [0, 0], sizes = [2, 32], strides = [1, 1]} : vector<2x128xf32> to vector<2x32xf32>
    %157 = arith.negf %156 : vector<2x32xf32>
    %158 = math.exp %157 : vector<2x32xf32>
    %cst_41 = arith.constant 1.000000e+00 : f32
    %159 = vector.broadcast %cst_41 : f32 to vector<2x32xf32>
    %160 = arith.addf %159, %158 : vector<2x32xf32>
    %161 = arith.divf %159, %160 : vector<2x32xf32>
    %162 = vector.extract_strided_slice %155 {offsets = [0, 32], sizes = [2, 32], strides = [1, 1]} : vector<2x128xf32> to vector<2x32xf32>
    %163 = arith.negf %162 : vector<2x32xf32>
    %164 = math.exp %163 : vector<2x32xf32>
    %cst_42 = arith.constant 1.000000e+00 : f32
    %165 = vector.broadcast %cst_42 : f32 to vector<2x32xf32>
    %166 = arith.addf %165, %164 : vector<2x32xf32>
    %167 = arith.divf %165, %166 : vector<2x32xf32>
    %168 = vector.extract_strided_slice %155 {offsets = [0, 64], sizes = [2, 32], strides = [1, 1]} : vector<2x128xf32> to vector<2x32xf32>
    %169 = math.tanh %168 : vector<2x32xf32>
    %170 = vector.extract_strided_slice %155 {offsets = [0, 96], sizes = [2, 32], strides = [1, 1]} : vector<2x128xf32> to vector<2x32xf32>
    %171 = arith.negf %170 : vector<2x32xf32>
    %172 = math.exp %171 : vector<2x32xf32>
    %cst_43 = arith.constant 1.000000e+00 : f32
    %173 = vector.broadcast %cst_43 : f32 to vector<2x32xf32>
    %174 = arith.addf %173, %172 : vector<2x32xf32>
    %175 = arith.divf %173, %174 : vector<2x32xf32>
    %176 = arith.mulf %167, %142 : vector<2x32xf32>
    %177 = arith.mulf %161, %169 : vector<2x32xf32>
    %178 = arith.addf %176, %177 : vector<2x32xf32>
    %179 = math.tanh %178 : vector<2x32xf32>
    %180 = arith.mulf %175, %179 : vector<2x32xf32>
    %181 = arith.truncf %180 : vector<2x32xf32> to vector<2x32xbf16>
    %182 = arith.index_cast %c4_i32 : i32 to index
    %c0_44 = arith.constant 0 : index
    %c0_45 = arith.constant 0 : index
    %183 = vector.load %arg3[%182, %c0_44, %c0_45] : memref<8x2x32xbf16, #tpu.memory_space<vmem>>, vector<1x2x32xbf16>
    %184 = vector.shape_cast %183 : vector<1x2x32xbf16> to vector<2x32xbf16>
    %185 = vector.shape_cast %181 : vector<2x32xbf16> to vector<1x2x32xbf16>
    tpu.vector_store %arg3[%182, %c0_44, %c0_45], %185 {strides = array<i32>} : memref<8x2x32xbf16, #tpu.memory_space<vmem>>, vector<1x2x32xbf16>,
    %c5_i32 = arith.constant 5 : i32
    %186 = arith.index_cast %c5_i32 : i32 to index
    %c0_46 = arith.constant 0 : index
    %c0_47 = arith.constant 0 : index
    %187 = vector.load %arg1[%186, %c0_46, %c0_47] : memref<8x2x128xf32, #tpu.memory_space<vmem>>, vector<1x2x128xf32>
    %188 = vector.shape_cast %187 : vector<1x2x128xf32> to vector<2x128xf32>
    %189 = arith.truncf %180 : vector<2x32xf32> to vector<2x32xbf16>
    %cst_48 = arith.constant dense<0.000000e+00> : vector<2x128xf32>
    %190 = tpu.matmul %189, %3, %cst_48 {dimension_numbers = #tpu.dot_dimension_numbers<[1], [0], [0], [1], [0, 0, 1, 1], [], []>} : vector<2x32xbf16>, vector<32x128xbf16>, vector<2x128xf32> -> vector<2x128xf32>
    %191 = arith.addf %188, %190 : vector<2x128xf32>
    %192 = vector.extract_strided_slice %191 {offsets = [0, 0], sizes = [2, 32], strides = [1, 1]} : vector<2x128xf32> to vector<2x32xf32>
    %193 = arith.negf %192 : vector<2x32xf32>
    %194 = math.exp %193 : vector<2x32xf32>
    %cst_49 = arith.constant 1.000000e+00 : f32
    %195 = vector.broadcast %cst_49 : f32 to vector<2x32xf32>
    %196 = arith.addf %195, %194 : vector<2x32xf32>
    %197 = arith.divf %195, %196 : vector<2x32xf32>
    %198 = vector.extract_strided_slice %191 {offsets = [0, 32], sizes = [2, 32], strides = [1, 1]} : vector<2x128xf32> to vector<2x32xf32>
    %199 = arith.negf %198 : vector<2x32xf32>
    %200 = math.exp %199 : vector<2x32xf32>
    %cst_50 = arith.constant 1.000000e+00 : f32
    %201 = vector.broadcast %cst_50 : f32 to vector<2x32xf32>
    %202 = arith.addf %201, %200 : vector<2x32xf32>
    %203 = arith.divf %201, %202 : vector<2x32xf32>
    %204 = vector.extract_strided_slice %191 {offsets = [0, 64], sizes = [2, 32], strides = [1, 1]} : vector<2x128xf32> to vector<2x32xf32>
    %205 = math.tanh %204 : vector<2x32xf32>
    %206 = vector.extract_strided_slice %191 {offsets = [0, 96], sizes = [2, 32], strides = [1, 1]} : vector<2x128xf32> to vector<2x32xf32>
    %207 = arith.negf %206 : vector<2x32xf32>
    %208 = math.exp %207 : vector<2x32xf32>
    %cst_51 = arith.constant 1.000000e+00 : f32
    %209 = vector.broadcast %cst_51 : f32 to vector<2x32xf32>
    %210 = arith.addf %209, %208 : vector<2x32xf32>
    %211 = arith.divf %209, %210 : vector<2x32xf32>
    %212 = arith.mulf %203, %178 : vector<2x32xf32>
    %213 = arith.mulf %197, %205 : vector<2x32xf32>
    %214 = arith.addf %212, %213 : vector<2x32xf32>
    %215 = math.tanh %214 : vector<2x32xf32>
    %216 = arith.mulf %211, %215 : vector<2x32xf32>
    %217 = arith.truncf %216 : vector<2x32xf32> to vector<2x32xbf16>
    %218 = arith.index_cast %c5_i32 : i32 to index
    %c0_52 = arith.constant 0 : index
    %c0_53 = arith.constant 0 : index
    %219 = vector.load %arg3[%218, %c0_52, %c0_53] : memref<8x2x32xbf16, #tpu.memory_space<vmem>>, vector<1x2x32xbf16>
    %220 = vector.shape_cast %219 : vector<1x2x32xbf16> to vector<2x32xbf16>
    %221 = vector.shape_cast %217 : vector<2x32xbf16> to vector<1x2x32xbf16>
    tpu.vector_store %arg3[%218, %c0_52, %c0_53], %221 {strides = array<i32>} : memref<8x2x32xbf16, #tpu.memory_space<vmem>>, vector<1x2x32xbf16>,
    %c6_i32 = arith.constant 6 : i32
    %222 = arith.index_cast %c6_i32 : i32 to index
    %c0_54 = arith.constant 0 : index
    %c0_55 = arith.constant 0 : index
    %223 = vector.load %arg1[%222, %c0_54, %c0_55] : memref<8x2x128xf32, #tpu.memory_space<vmem>>, vector<1x2x128xf32>
    %224 = vector.shape_cast %223 : vector<1x2x128xf32> to vector<2x128xf32>
    %225 = arith.truncf %216 : vector<2x32xf32> to vector<2x32xbf16>
    %cst_56 = arith.constant dense<0.000000e+00> : vector<2x128xf32>
    %226 = tpu.matmul %225, %3, %cst_56 {dimension_numbers = #tpu.dot_dimension_numbers<[1], [0], [0], [1], [0, 0, 1, 1], [], []>} : vector<2x32xbf16>, vector<32x128xbf16>, vector<2x128xf32> -> vector<2x128xf32>
    %227 = arith.addf %224, %226 : vector<2x128xf32>
    %228 = vector.extract_strided_slice %227 {offsets = [0, 0], sizes = [2, 32], strides = [1, 1]} : vector<2x128xf32> to vector<2x32xf32>
    %229 = arith.negf %228 : vector<2x32xf32>
    %230 = math.exp %229 : vector<2x32xf32>
    %cst_57 = arith.constant 1.000000e+00 : f32
    %231 = vector.broadcast %cst_57 : f32 to vector<2x32xf32>
    %232 = arith.addf %231, %230 : vector<2x32xf32>
    %233 = arith.divf %231, %232 : vector<2x32xf32>
    %234 = vector.extract_strided_slice %227 {offsets = [0, 32], sizes = [2, 32], strides = [1, 1]} : vector<2x128xf32> to vector<2x32xf32>
    %235 = arith.negf %234 : vector<2x32xf32>
    %236 = math.exp %235 : vector<2x32xf32>
    %cst_58 = arith.constant 1.000000e+00 : f32
    %237 = vector.broadcast %cst_58 : f32 to vector<2x32xf32>
    %238 = arith.addf %237, %236 : vector<2x32xf32>
    %239 = arith.divf %237, %238 : vector<2x32xf32>
    %240 = vector.extract_strided_slice %227 {offsets = [0, 64], sizes = [2, 32], strides = [1, 1]} : vector<2x128xf32> to vector<2x32xf32>
    %241 = math.tanh %240 : vector<2x32xf32>
    %242 = vector.extract_strided_slice %227 {offsets = [0, 96], sizes = [2, 32], strides = [1, 1]} : vector<2x128xf32> to vector<2x32xf32>
    %243 = arith.negf %242 : vector<2x32xf32>
    %244 = math.exp %243 : vector<2x32xf32>
    %cst_59 = arith.constant 1.000000e+00 : f32
    %245 = vector.broadcast %cst_59 : f32 to vector<2x32xf32>
    %246 = arith.addf %245, %244 : vector<2x32xf32>
    %247 = arith.divf %245, %246 : vector<2x32xf32>
    %248 = arith.mulf %239, %214 : vector<2x32xf32>
    %249 = arith.mulf %233, %241 : vector<2x32xf32>
    %250 = arith.addf %248, %249 : vector<2x32xf32>
    %251 = math.tanh %250 : vector<2x32xf32>
    %252 = arith.mulf %247, %251 : vector<2x32xf32>
    %253 = arith.truncf %252 : vector<2x32xf32> to vector<2x32xbf16>
    %254 = arith.index_cast %c6_i32 : i32 to index
    %c0_60 = arith.constant 0 : index
    %c0_61 = arith.constant 0 : index
    %255 = vector.load %arg3[%254, %c0_60, %c0_61] : memref<8x2x32xbf16, #tpu.memory_space<vmem>>, vector<1x2x32xbf16>
    %256 = vector.shape_cast %255 : vector<1x2x32xbf16> to vector<2x32xbf16>
    %257 = vector.shape_cast %253 : vector<2x32xbf16> to vector<1x2x32xbf16>
    tpu.vector_store %arg3[%254, %c0_60, %c0_61], %257 {strides = array<i32>} : memref<8x2x32xbf16, #tpu.memory_space<vmem>>, vector<1x2x32xbf16>,
    %c7_i32 = arith.constant 7 : i32
    %258 = arith.index_cast %c7_i32 : i32 to index
    %c0_62 = arith.constant 0 : index
    %c0_63 = arith.constant 0 : index
    %259 = vector.load %arg1[%258, %c0_62, %c0_63] : memref<8x2x128xf32, #tpu.memory_space<vmem>>, vector<1x2x128xf32>
    %260 = vector.shape_cast %259 : vector<1x2x128xf32> to vector<2x128xf32>
    %261 = arith.truncf %252 : vector<2x32xf32> to vector<2x32xbf16>
    %cst_64 = arith.constant dense<0.000000e+00> : vector<2x128xf32>
    %262 = tpu.matmul %261, %3, %cst_64 {dimension_numbers = #tpu.dot_dimension_numbers<[1], [0], [0], [1], [0, 0, 1, 1], [], []>} : vector<2x32xbf16>, vector<32x128xbf16>, vector<2x128xf32> -> vector<2x128xf32>
    %263 = arith.addf %260, %262 : vector<2x128xf32>
    %264 = vector.extract_strided_slice %263 {offsets = [0, 0], sizes = [2, 32], strides = [1, 1]} : vector<2x128xf32> to vector<2x32xf32>
    %265 = arith.negf %264 : vector<2x32xf32>
    %266 = math.exp %265 : vector<2x32xf32>
    %cst_65 = arith.constant 1.000000e+00 : f32
    %267 = vector.broadcast %cst_65 : f32 to vector<2x32xf32>
    %268 = arith.addf %267, %266 : vector<2x32xf32>
    %269 = arith.divf %267, %268 : vector<2x32xf32>
    %270 = vector.extract_strided_slice %263 {offsets = [0, 32], sizes = [2, 32], strides = [1, 1]} : vector<2x128xf32> to vector<2x32xf32>
    %271 = arith.negf %270 : vector<2x32xf32>
    %272 = math.exp %271 : vector<2x32xf32>
    %cst_66 = arith.constant 1.000000e+00 : f32
    %273 = vector.broadcast %cst_66 : f32 to vector<2x32xf32>
    %274 = arith.addf %273, %272 : vector<2x32xf32>
    %275 = arith.divf %273, %274 : vector<2x32xf32>
    %276 = vector.extract_strided_slice %263 {offsets = [0, 64], sizes = [2, 32], strides = [1, 1]} : vector<2x128xf32> to vector<2x32xf32>
    %277 = math.tanh %276 : vector<2x32xf32>
    %278 = vector.extract_strided_slice %263 {offsets = [0, 96], sizes = [2, 32], strides = [1, 1]} : vector<2x128xf32> to vector<2x32xf32>
    %279 = arith.negf %278 : vector<2x32xf32>
    %280 = math.exp %279 : vector<2x32xf32>
    %cst_67 = arith.constant 1.000000e+00 : f32
    %281 = vector.broadcast %cst_67 : f32 to vector<2x32xf32>
    %282 = arith.addf %281, %280 : vector<2x32xf32>
    %283 = arith.divf %281, %282 : vector<2x32xf32>
    %284 = arith.mulf %275, %250 : vector<2x32xf32>
    %285 = arith.mulf %269, %277 : vector<2x32xf32>
    %286 = arith.addf %284, %285 : vector<2x32xf32>
    %287 = math.tanh %286 : vector<2x32xf32>
    %288 = arith.mulf %283, %287 : vector<2x32xf32>
    %289 = arith.truncf %288 : vector<2x32xf32> to vector<2x32xbf16>
    %290 = arith.index_cast %c7_i32 : i32 to index
    %c0_68 = arith.constant 0 : index
    %c0_69 = arith.constant 0 : index
    %291 = vector.load %arg3[%290, %c0_68, %c0_69] : memref<8x2x32xbf16, #tpu.memory_space<vmem>>, vector<1x2x32xbf16>
    %292 = vector.shape_cast %291 : vector<1x2x32xbf16> to vector<2x32xbf16>
    %293 = vector.shape_cast %289 : vector<2x32xbf16> to vector<1x2x32xbf16>
    tpu.vector_store %arg3[%290, %c0_68, %c0_69], %293 {strides = array<i32>} : memref<8x2x32xbf16, #tpu.memory_space<vmem>>, vector<1x2x32xbf16>,
    %c8_i32 = arith.constant 8 : i32
    %c0_70 = arith.constant 0 : index
    %c0_71 = arith.constant 0 : index
    %294 = vector.load %arg4[%c0_70, %c0_71] : memref<2x32xf32, #tpu.memory_space<vmem>>, vector<2x32xf32>
    tpu.vector_store %arg4[%c0_70, %c0_71], %288 {strides = array<i32>} : memref<2x32xf32, #tpu.memory_space<vmem>>, vector<2x32xf32>,
    %c0_72 = arith.constant 0 : index
    %c0_73 = arith.constant 0 : index
    %295 = vector.load %arg5[%c0_72, %c0_73] : memref<2x32xf32, #tpu.memory_space<vmem>>, vector<2x32xf32>
    tpu.vector_store %arg5[%c0_72, %c0_73], %286 {strides = array<i32>} : memref<2x32xf32, #tpu.memory_space<vmem>>, vector<2x32xf32>,
    return
  }
  func.func @transform_0(%arg0: i32) -> (i32, i32, i32) {
    %c0_i32 = arith.constant 0 : i32
    %c0_i32_0 = arith.constant 0 : i32
    %c0_i32_1 = arith.constant 0 : i32
    return %arg0, %c0_i32, %c0_i32_0 : i32, i32, i32
  }
  func.func @transform_1(%arg0: i32) -> (i32, i32) {
    %c0_i32 = arith.constant 0 : i32
    %c0_i32_0 = arith.constant 0 : i32
    %c0_i32_1 = arith.constant 0 : i32
    return %c0_i32, %c0_i32_0 : i32, i32
  }
  func.func @transform_2(%arg0: i32) -> (i32, i32, i32) {
    %c0_i32 = arith.constant 0 : i32
    %c0_i32_0 = arith.constant 0 : i32
    %c0_i32_1 = arith.constant 0 : i32
    return %arg0, %c0_i32, %c0_i32_0 : i32, i32, i32
  }
  func.func @transform_3(%arg0: i32) -> (i32, i32) {
    %c0_i32 = arith.constant 0 : i32
    %c0_i32_0 = arith.constant 0 : i32
    %c0_i32_1 = arith.constant 0 : i32
    return %c0_i32, %c0_i32_0 : i32, i32
  }
  func.func @transform_4(%arg0: i32) -> (i32, i32) {
    %c0_i32 = arith.constant 0 : i32
    %c0_i32_0 = arith.constant 0 : i32
    %c0_i32_1 = arith.constant 0 : i32
    return %c0_i32, %c0_i32_0 : i32, i32
  }
}

module attributes {stable_mosaic.version = 11 : i64} {
  func.func @_linear_softmax_kernel(%arg0: i32, %arg1: i32, %arg2: memref<1x8x32xbf16, #tpu.memory_space<vmem>>, %arg3: memref<32x16xbf16, #tpu.memory_space<vmem>>, %arg4: memref<1x16xf32, #tpu.memory_space<vmem>>, %arg5: memref<1x8x16xf32, #tpu.memory_space<vmem>>) attributes {dimension_semantics = [#tpu.dimension_semantics<parallel>, #tpu.dimension_semantics<parallel>], iteration_bounds = array<i64: 2, 1>, scalar_prefetch = 0 : i64, scratch_operands = 0 : i64, tpu.core_type = #tpu.core_type<tc>, window_params = [{transform_indices = @transform_0, window_bounds = array<i64: 1, 8, 32>}, {transform_indices = @transform_1, window_bounds = array<i64: 32, 16>}, {transform_indices = @transform_2, window_bounds = array<i64: 1, 16>}, {transform_indices = @transform_3, window_bounds = array<i64: 1, 8, 16>}]} {
    %c0 = arith.constant 0 : index
    %c0_0 = arith.constant 0 : index
    %c0_1 = arith.constant 0 : index
    %0 = vector.load %arg2[%c0, %c0_0, %c0_1] : memref<1x8x32xbf16, #tpu.memory_space<vmem>>, vector<1x8x32xbf16>
    %1 = vector.shape_cast %0 : vector<1x8x32xbf16> to vector<8x32xbf16>
    %c0_2 = arith.constant 0 : index
    %c0_3 = arith.constant 0 : index
    %2 = vector.load %arg3[%c0_2, %c0_3] : memref<32x16xbf16, #tpu.memory_space<vmem>>, vector<32x16xbf16>
    %cst = arith.constant dense<0.000000e+00> : vector<8x16xf32>
    %3 = tpu.matmul %1, %2, %cst {dimension_numbers = #tpu.dot_dimension_numbers<[1], [0], [0], [1], [0, 0, 1, 1], [], []>} : vector<8x32xbf16>, vector<32x16xbf16>, vector<8x16xf32> -> vector<8x16xf32>
    %c0_4 = arith.constant 0 : index
    %c0_5 = arith.constant 0 : index
    %4 = vector.load %arg4[%c0_4, %c0_5] : memref<1x16xf32, #tpu.memory_space<vmem>>, vector<1x16xf32>
    %5 = vector.broadcast %4 : vector<1x16xf32> to vector<8x16xf32>
    %6 = arith.addf %3, %5 : vector<8x16xf32>
    %cst_6 = arith.constant dense<0xFF800000> : vector<16xf32>
    %7 = vector.multi_reduction <maximumf>, %6, %cst_6 [0] : vector<8x16xf32> to vector<16xf32>
    %8 = vector.shape_cast %7 : vector<16xf32> to vector<1x16xf32>
    %9 = vector.broadcast %8 : vector<1x16xf32> to vector<8x16xf32>
    %10 = arith.subf %6, %9 : vector<8x16xf32>
    %11 = math.exp %10 : vector<8x16xf32>
    %cst_7 = arith.constant dense<0.000000e+00> : vector<16xf32>
    %12 = vector.multi_reduction <add>, %11, %cst_7 [0] : vector<8x16xf32> to vector<16xf32>
    %13 = vector.shape_cast %12 : vector<16xf32> to vector<1x16xf32>
    %14 = tpu.reciprocal %13 {approx = true} : vector<1x16xf32> -> vector<1x16xf32>
    %15 = vector.broadcast %14 : vector<1x16xf32> to vector<8x16xf32>
    %16 = arith.mulf %11, %15 : vector<8x16xf32>
    %c0_8 = arith.constant 0 : index
    %c0_9 = arith.constant 0 : index
    %c0_10 = arith.constant 0 : index
    %17 = vector.load %arg5[%c0_8, %c0_9, %c0_10] : memref<1x8x16xf32, #tpu.memory_space<vmem>>, vector<1x8x16xf32>
    %18 = vector.shape_cast %17 : vector<1x8x16xf32> to vector<8x16xf32>
    %19 = vector.shape_cast %16 : vector<8x16xf32> to vector<1x8x16xf32>
    tpu.vector_store %arg5[%c0_8, %c0_9, %c0_10], %19 {strides = array<i32>} : memref<1x8x16xf32, #tpu.memory_space<vmem>>, vector<1x8x16xf32>,
    return
  }
  func.func @transform_0(%arg0: i32, %arg1: i32) -> (i32, i32, i32) {
    %c0_i32 = arith.constant 0 : i32
    %c0_i32_0 = arith.constant 0 : i32
    %c0_i32_1 = arith.constant 0 : i32
    return %arg0, %c0_i32, %c0_i32_0 : i32, i32, i32
  }
  func.func @transform_1(%arg0: i32, %arg1: i32) -> (i32, i32) {
    %c0_i32 = arith.constant 0 : i32
    %c0_i32_0 = arith.constant 0 : i32
    return %c0_i32, %arg1 : i32, i32
  }
  func.func @transform_2(%arg0: i32, %arg1: i32) -> (i32, i32) {
    %c0_i32 = arith.constant 0 : i32
    %c0_i32_0 = arith.constant 0 : i32
    return %c0_i32, %arg1 : i32, i32
  }
  func.func @transform_3(%arg0: i32, %arg1: i32) -> (i32, i32, i32) {
    %c0_i32 = arith.constant 0 : i32
    %c0_i32_0 = arith.constant 0 : i32
    return %arg0, %c0_i32, %arg1 : i32, i32, i32
  }
}

</mosaic_0001>

<bundles_post_ra>
// kernel: gerador_forward.3
= control target key start
LH: loop header
LB: loop body
LE: loop exit
PB: predicated region body
PF: predicated region fallthrough
CT: control target
= control target key end

     0   :  { %8 = vsyncpa [#allocation3], 0  ;;  %s714_s0 = inlined_call_operand.vmem [shape: bf16[2,8,32], index: 0, kind: input, shape index: {}]   ;;  %s715_s1 = inlined_call_operand.vmem [shape: bf16[32,16], index: 1, kind: input, shape index: {}]   ;;  %s716_s2 = inlined_call_operand.vmem [shape: f32[1,16], index: 2, kind: input, shape index: {}]   ;;  %s717_s3 = inlined_call_operand.hbm [shape: f32[2,8,16], index: 3, kind: output, shape index: {}]  }
   0x1   :  { %10 = vsyncpa [#allocation3 + $0x1], 0  ;;  %s603_s12 = smov 0   ;;  %s605_s13 = smov 0  }
   0x2   :  { %s607_s14 = smov 0   ;;  %s609_s15 = smov 0  }
   0x3   :  { %s611_s16 = smov 0   ;;  %s613_s17 = smov 0  }
   0x4 LB: > { %s411_s18 = sadd.s32 4294967295, %s578_s17   ;;  %s412_s19 = sadd.s32 4294967294, %s578_s17   ;;  %s578_s17 = sphi %s613_s17, %s16_s17   ;;  %s574_s16 = sphi %s611_s16, %s724_s16   ;;  %s570_s15 = sphi %s609_s15, %s723_s15   ;;  %s566_s14 = sphi %s607_s14, %s722_s14   ;;  %s562_s13 = sphi %s605_s13, %s721_s13   ;;  %s558_s12 = sphi %s603_s12, %s720_s12  }
   0x5   : > { %s28_s20 = sadd.s32 1, %s574_s16  ;;  %s115_s21 = sadd.s32 1, %s566_s14 }
   0x6   : > { %p30_p0 = scmp.ge.s32.totalorder %s28_s20, 2  ;;  %p125_p1 = scmp.ne.s32.totalorder %s566_s14, %s562_s13 }
   0x7   : > { %p126_p2 = scmp.eq.s32.totalorder %s411_s18, 1  ;;  %p131_p3 = scmp.ne.s32.totalorder %s562_s13, %s558_s12 }
   0x8   : > { %s726_s20 = smov (%p30_p0, %s28_s20), 0  ;;  %p132_p5 = scmp.eq.s32.totalorder %s412_s19, 1 }
   0x9   : > { %p643_p4 = por %p126_p2, %p125_p1  ;;  %s110_s23 = ssub.s32 %s574_s16, %s726_s20 }
   0xa   : > { %p417_p6 = scmp.ge.s32.totalorder %s578_s17, 1  ;;  %p113_p7 = scmp.eq.s32.totalorder %s110_s23, 0 }
   0xb   : > { %p650_p8 = por %p132_p5, %p131_p3  ;;  %p170_p9 = scmp.lt.s32.totalorder %s578_s17, 3 }
   0xc   : > { %s656_s25 = scalar_select %p113_p7, %s566_s14, %s115_s21  }
   0xd   : > { %p171_p10 = pnand %p417_p6, %p170_p9 }
   0xe   : > { %p200_p11 = scmp.lt.s32.totalorder (!%p171_p10), %s570_s15, 1  ;;  %s197_s10 = sand.u32 (!%p171_p10), 1, %s562_s13  }
   0xf   : > { %174 = sbr.rel (%p171_p10) target bundleno = 297 (0x129), region = 32  ;;  %s418_s11 = sshll.u32 (!%p171_p10), %s197_s10, 3 }
  0x10   : > { %s425_s18 = sshll.u32 (!%p171_p10), %s570_s15, 7  ;;  %s199_s19 = scalar_lea.vmem (!%p171_p10), [#allocation2], %s418_s11 }
  0x11   : > { %s316_s21 = sshll.u32 (!%p171_p10), %s199_s19, 4  ;;  %s314_s27 = scalar_lea.hbm (!%p171_p10), %s717_s3, %s425_s18  ;;  %s317_s21 = int_to_ptr.vmem [resolvable:$true] %s316_s21 }
  0x12   : > { %s302_s28 = scalar_lea.sflag (!%p171_p10), [#allocation3], %s197_s10  ;;  %s502_s29 = scalar_lea.vmem (!%p171_p10), %s317_s21, 128 }
  0x13   : > { %p503_p12 = scmp.ne.s32.totalorder (!%p171_p10), %s317_s21, %s502_s29 }
  0x14   : > { %v496_v0 = vld [vmem:[%s715_s1 + $0x8] sm:$0xff]   ;;  %v580_v1 = vmov 0.0   ;;  %v497_v2 = vld [vmem:[%s715_s1] sm:$0xff]   ;;  %vm581_vm0 = vmmov 0   ;;  %s201_s30 = scalar_select %p200_p11, %s570_s15, 1  ;;  %vm236_vm1 = vcmask 261120  }
  0x15   : > { %431 = vmatprep.subr.bf16.mxu0 %v580_v1  ;;  %435 = vmatprep.mubr.msk.bf16.mxu0 %vm581_vm0, %v580_v1  ;;  %v420_v4 = vld [vmem:[%s716_s2] ss:$0 sm:$0xff]  ;;  %vm280_vm2 = vcmask 130048   ;;  %p504_p13 = pnand %p503_p12, %p643_p4 }
  0x16   : > { %432 = vmatpush3.bf16.msra.mxu0 %v496_v0  ;;  %s419_s4 = sshll.u32 %s201_s30, 2  ;;  %s582_s30 = smov [#allocation2]  }
  0x17   : > { %433 = vmatprep.subr.bf16.mxu0 %v580_v1  ;;  %s203_s7 = scalar_lea.vmem %s714_s0, %s419_s4  ;;  %p505_p0 = pneg %p504_p13 }
  0x18   : > { %v212_v3 = vld [vmem:[%s203_s7] sm:$0xf]  ;;  %s506_s4 = sshll.u32 %s582_s30, 4  ;;  %s507_s4 = int_to_ptr.vmem [resolvable:$false] %s506_s4 }
  0x19   : > { %s508_s15 = scalar_lea.vmem %s507_s4, 256  ;;  %p509_p1 = scmp.lt.s32.totalorder %s317_s21, %s507_s4 }
  0x1a   : > { %434 = vmatpush3.bf16.msra.mxu0 %v497_v2  ;;  %p510_p2 = scmp.lt.s32.totalorder %s508_s15, %s502_s29 }
  0x1c   : > { %p511_p3 = por %p510_p2, %p509_p1 }
  0x1d   : > { %436 = vmatmul.mubr.msk.bf16.vlgmr.msra.gmra.mxu0 %vm236_vm1, %v212_v3 }
  0x1e   : > { %p512_p5 = pnand %p511_p3, %p505_p0 }
  0xdd   : > { %v274_v5 = vpop.f32.mrf.mxu0 }
  0xde   : > { %v275_v6 = vadd.f32 %v420_v4, %v274_v5 }
  0xdf   : > { %v437_v7 = vpop.f32.mrf.mxu0 }
  0xe0   : > { %v281_v8 = vsel %vm280_vm2, %v275_v6, -inf }
  0xe1   : > { %v282_v9 = vrot.slane %v281_v8, 4  ;;  %v277_v10 = vpop.f32.mrf.mxu0 }
  0xe3   : > { %v283_v11 = vmax.f32 %v281_v8, %v282_v9  ;;  %v438_v12 = vpop.f32.mrf.mxu0 }
  0xe5   : > { %v284_v13 = vrot.slane %v283_v11, 2 }
  0xe7   : > { %v285_v14 = vmax.f32 %v283_v11, %v284_v13 }
  0xe9   : > { %v286_v15 = vrot.slane %v285_v14, 1 }
  0xeb   : > { %v287_v16 = vmax.f32 %v285_v14, %v286_v15 }
  0xed   : > { %v288_v17 = vsub.f32 %v275_v6, %v287_v16 }
  0xef   : > { %v289_v18 = vmul.f32 1.442695, %v288_v17 }
  0xf1   : > { %498 = vpow2.f32 %v289_v18 }
  0xfe   : > { %v499_v19 = vpop.eup %498 }
  0xff   : > { %v291_v20 = vsel %vm280_vm2, %v499_v19, 0.0 }
 0x100   : > { %v292_v21 = vrot.slane %v291_v20, 4 }
 0x102   : > { %v293_v22 = vadd.f32 %v292_v21, %v291_v20 }
 0x104   : > { %v294_v23 = vrot.slane %v293_v22, 2 }
 0x106   : > { %v295_v24 = vadd.f32 %v294_v23, %v293_v22 }
 0x108   : > { %v296_v25 = vrot.slane %v295_v24, 1 }
 0x10a   : > { %v297_v26 = vadd.f32 %v296_v25, %v295_v24 }
 0x10c   : > { %500 = vrcp.f32 %v297_v26 }
 0x119   : > { %v501_v27 = vpop.eup %500 }
 0x11a   : > { %v299_v28 = vmul.f32 %v501_v27, %v499_v19 }
 0x11c   : > { %300 = vst.msk [vmem:[%s199_s19] sm:$0xff] %vm280_vm2, %v299_v28 }
 0x11d   : > { %515 = shalt.err (!%p512_p5)
}
 0x11e   : > { %s516_s5 = scalar_lea.hbm %s314_s27, 128  ;;  %s520_s8 = scalar_lea.hbm %s717_s3, 256 }
 0x11f   : > { %p517_p6 = scmp.ne.s32.totalorder %s314_s27, %s516_s5  ;;  %p521_p10 = scmp.lt.s32.totalorder %s314_s27, %s717_s3 }
 0x120   : > { %p522_p11 = scmp.lt.s32.totalorder %s520_s8, %s516_s5 }
 0x121   : > { %p518_p7 = pnand %p517_p6, %p643_p4 }
 0x122   : > { %p523_p12 = por %p522_p11, %p521_p10 }
 0x123   : > { %p519_p9 = pneg %p518_p7 }
 0x125   : > { %p524_p13 = pnand %p523_p12, %p519_p9 }
 0x127   : > { %527 = shalt.err (!%p524_p13)
}
 0x128   : > { %439 = dma.vmem_to_hbm [thread:$0]  (%p643_p4), %s317_s21, 128, %s314_s27, %s302_s28  }
 0x129 PF: > { %p445_p0 = scmp.ge.s32.totalorder %s578_s17, 2  ;;  %s328_s11 = sand.u32 1, %s558_s12  }
 0x12a   : > { %s329_s18 = scalar_lea.sflag [#allocation3], %s328_s11 }
 0x12b   : > { %p442_p1 = pnand %p445_p0, %p650_p8 }
 0x12d   : > { %p443_p2 = pneg %p442_p1 }
 0x12f   : > { %553 = dma.done.wait (%p443_p2), %s329_s18, 128  }
 0x130   : > { %555 = vsyncadd (%p443_p2), %s329_s18, 4294967168  ;;  %s16_s17 = sadd.s32 1, %s578_s17   ;;  %s720_s12 = smov %s562_s13 }
 0x131   : > { %p13_p3 = scmp.ge.s32.totalorder %s16_s17, 4   ;;  %s721_s13 = smov %s566_s14 }
 0x132   : > { %s722_s14 = smov %s656_s25  ;;  %s723_s15 = smov %s574_s16 }
 0x133   : > { %s724_s16 = smov %s726_s20  ;;  %15 = sbr.rel (!%p13_p3) target bundleno = 4 (0x4), region = 73 }
 0x138   :  { %334 = vsyncpa [#allocation3], 1 }
 0x139   :  { %336 = vsyncpa [#allocation3 + $0x1], 1 }

// kernel: gerador_forward.2
= control target key start
LH: loop header
LB: loop body
LE: loop exit
PB: predicated region body
PF: predicated region fallthrough
CT: control target
= control target key end

     0   :  { %10 = vsyncpa [#allocation3], 0  ;;  %v1070_v1 = vmov 0.0   ;;  %vm1071_vm0 = vmmov 0   ;;  %vm21_vm1 = vcmask 254976   ;;  %s1306_s0 = inlined_call_operand.vmem [shape: f32[8,2,128], index: 0, kind: input, shape index: {}]   ;;  %s1307_s1 = inlined_call_operand.vmem [shape: bf16[32,128], index: 1, kind: input, shape index: {}]   ;;  %s1308_s2 = inlined_call_operand.vmem [shape: bf16[8,2,32], index: 2, kind: output, shape index: {0}]   ;;  %s1309_s3 = inlined_call_operand.hbm [shape: f32[2,32], index: 3, kind: output, shape index: {1}]   ;;  %s1310_s4 = inlined_call_operand.hbm [shape: f32[2,32], index: 4, kind: output, shape index: {2}]  }
   0x1   :  { %v1106_v0 = vld [vmem:[%s1307_s1 + $0x8] sm:$0xff]   ;;  %888 = vmatprep.subr.bf16.mxu0 %v1070_v1  ;;  %896 = vmatprep.subr.bf16.mxu1 %v1070_v1  ;;  %v1114_v2 = vld [vmem:[%s1307_s1] sm:$0xff]  }
   0x2   :  { %889 = vmatpush3.bf16.msra.mxu0 %v1106_v0  ;;  %892 = vmatprep.mubr.msk.bf16.mxu0 %vm1071_vm0, %v1070_v1 }
   0x3   :  { %11 = vsyncpa [#allocation5], 0  ;;  %890 = vmatprep.subr.bf16.mxu0 %v1070_v1  ;;  %22 = vst.msk [vmem:[#allocation2] sm:$0x3] %vm21_vm1, %v1070_v1  ;;  %897 = vmatpush3.bf16.msra.mxu1 %v1106_v0  ;;  %vm44_vm2 = vcmask 261120   ;;  %s1072_s20 = smov 64  }
   0x4   :  { %23 = vst.msk [vmem:[#allocation4] sm:$0x3] %vm21_vm1, %v1070_v1  ;;  %898 = vmatprep.subr.bf16.mxu1 %v1070_v1  ;;  %900 = vmatprep.mubr.msk.bf16.mxu1 %vm1071_vm0, %v1070_v1  ;;  %v30_v5 = vld [vmem:[%s1306_s0] sm:$0x3]  ;;  %s1073_s21 = smov 32   ;;  %vm136_vm3 = vcmask 253952  }
   0x5   :  { %v836_v28 = vld [vmem:[%s1306_s0 + $0x2] sm:$0x3]  ;;  %v840_v49 = vld [vmem:[%s1306_s0 + $0x4] sm:$0x3]  ;;  %s1075_s15 = smov 96   ;;  %s1076_s16 = smov [#allocation4]  }
   0x6   :  { %891 = vmatpush3.bf16.msra.mxu0 %v1114_v2  ;;  %s818_s17 = sshll.u32 %s1076_s16, 4  ;;  %s819_s17 = int_to_ptr.vmem [resolvable:$true] %s818_s17 }
   0x7   :  { %899 = vmatpush3.bf16.msra.mxu1 %v1114_v2  ;;  %904 = vmatprep.subr.bf16.mxu0 %v1070_v1  ;;  %s1026_s18 = scalar_lea.vmem %s819_s17, 32  ;;  %p1031_p1 = scmp.lt.s32.totalorder %s819_s17, %s819_s17 }
   0x8   :  { %912 = vmatprep.subr.bf16.mxu1 %v1070_v1  ;;  %p1027_p0 = scmp.ne.s32.totalorder %s819_s17, %s1026_s18  ;;  %p1032_p2 = scmp.lt.s32.totalorder %s1026_s18, %s1026_s18 }
   0xa   :  { %v28_v3 = vld [vmem:[#allocation2] sm:$0x3]  ;;  %p1033_p3 = por %p1032_p2, %p1031_p1 }
   0xb   :  { %v31_v4 = vpack.c.bf16 %v28_v3, %v28_v3  ;;  %v29_v12 = vld [vmem:[#allocation4] sm:$0x3] }
   0xc   :  { %p1034_p4 = pnand %p1033_p3, %p1027_p0 }
   0xd   :  { %893 = vmatmul.mubr.msk.bf16.vlgmr.msra.gmra.mxu0 %vm44_vm2, %v31_v4 }
   0xe   :  { %905 = vmatpush3.bf16.msra.mxu0 %v1106_v0  ;;  %908 = vmatprep.mubr.msk.bf16.mxu0 %vm1071_vm0, %v1070_v1 }
   0xf   :  { %906 = vmatprep.subr.bf16.mxu0 %v1070_v1 }
  0x12   :  { %907 = vmatpush3.bf16.msra.mxu0 %v1114_v2 }
  0x13   :  { %920 = vmatprep.subr.bf16.mxu0 %v1070_v1 }
  0xcd   :  { %v82_v6 = vpop.f32.mrf.mxu0 }
  0xce   :  { %v88_v7 = vadd.f32 %v82_v6, %v30_v5 }
  0xcf   :  { %v894_v8 = vpop.f32.mrf.mxu0 }
  0xd0   :  { %962 = vtanh.f32 %v88_v7  ;;  %v835_v13 = vmul.f32 -1.442695, %v88_v7 }
  0xd1   :  { %v85_v9 = vpop.f32.mrf.mxu0 }
  0xd2   :  { %964 = vpow2.f32 %v835_v13  ;;  %v844_v9 = vld [vmem:[%s1306_s0 + $0x6] sm:$0x3] }
  0xd3   :  { %v895_v10 = vpop.f32.mrf.mxu0 }
  0xdd   :  { %v963_v11 = vpop.eup %962 }
  0xde   :  { %102 = vrot.lane.b32.xlu0 %v963_v11, %s1072_s20 }
  0xdf   :  { %v965_v14 = vpop.eup %964 }
  0xe0   :  { %v92_v15 = vadd.f32 1.0, %v965_v14 }
  0xe2   :  { %97 = vrot.lane.b32.xlu0 %v29_v12, %s1073_s21  ;;  %966 = vrcp.f32 %v92_v15 }
  0xef   :  { %v967_v16 = vpop.eup %966 }
 0x150   :  { %v103_v17 = vpop.permute.xlu0 %102 }
 0x151   :  { %v105_v18 = vmul.f32 %v967_v16, %v103_v17 }
 0x153   :  { %107 = vrot.lane.b32.xlu1 %v105_v18, %s1073_s21 }
 0x154   :  { %v98_v19 = vpop.permute.xlu0 %97 }
 0x155   :  { %v100_v20 = vmul.f32 %v967_v16, %v98_v19 }
 0x1c5   :  { %v108_v21 = vpop.permute.xlu1 %107 }
 0x1c6   :  { %v110_v22 = vadd.f32 %v108_v21, %v100_v20 }
 0x1c8   :  { %968 = vtanh.f32 %v110_v22 }
 0x1d5   :  { %v969_v23 = vpop.eup %968 }
 0x1d6   :  { %113 = vrot.lane.b32.xlu1 %v969_v23, %s1072_s20 }
 0x248   :  { %v114_v24 = vpop.permute.xlu1 %113 }
 0x249   :  { %v116_v25 = vmul.f32 %v967_v16, %v114_v24 }
 0x24b   :  { %v1145_v26 = vpack.c.bf16 %v116_v25, %v116_v25 }
 0x24d   :  { %140 = vrot.lane.b32.xlu0 %v1145_v26, %s1073_s21 }
 0x2bf   :  { %v141_v27 = vpop.permute.xlu0 %140 }
 0x2c0   :  { %901 = vmatmul.mubr.msk.bf16.vlgmr.msra.gmra.mxu1 %vm44_vm2, %v141_v27 }
 0x2c1   :  { %913 = vmatpush3.bf16.msra.mxu1 %v1106_v0  ;;  %916 = vmatprep.mubr.msk.bf16.mxu1 %vm1071_vm0, %v1070_v1 }
 0x2c2   :  { %914 = vmatprep.subr.bf16.mxu1 %v1070_v1 }
 0x2c5   :  { %915 = vmatpush3.bf16.msra.mxu1 %v1114_v2 }
 0x2c6   :  { %928 = vmatprep.subr.bf16.mxu1 %v1070_v1 }
 0x380   :  { %v179_v29 = vpop.f32.mrf.mxu1 }
 0x381   :  { %v185_v30 = vadd.f32 %v836_v28, %v179_v29 }
 0x382   :  { %v902_v31 = vpop.f32.mrf.mxu1 }
 0x383   :  { %970 = vtanh.f32 %v185_v30  ;;  %v838_v35 = vmul.f32 -1.442695, %v185_v30  ;;  %v848_v31 = vld [vmem:[%s1306_s0 + $0x8] sm:$0x3] }
 0x384   :  { %v182_v32 = vpop.f32.mrf.mxu1 }
 0x385   :  { %972 = vpow2.f32 %v838_v35 }
 0x386   :  { %v903_v33 = vpop.f32.mrf.mxu1 }
 0x390   :  { %v971_v34 = vpop.eup %970 }
 0x391   :  { %195 = vrot.lane.b32.xlu1 %v971_v34, %s1072_s20 }
 0x392   :  { %v973_v36 = vpop.eup %972 }
 0x393   :  { %v189_v37 = vadd.f32 1.0, %v973_v36 }
 0x395   :  { %974 = vrcp.f32 %v189_v37 }
 0x3a2   :  { %v975_v38 = vpop.eup %974 }
 0x3a3   :  { %v193_v41 = vmul.f32 %v975_v38, %v110_v22 }
 0x403   :  { %v196_v39 = vpop.permute.xlu1 %195 }
 0x404   :  { %v198_v40 = vmul.f32 %v975_v38, %v196_v39 }
 0x406   :  { %200 = vrot.lane.b32.xlu0 %v198_v40, %s1073_s21 }
 0x478   :  { %v201_v42 = vpop.permute.xlu0 %200 }
 0x479   :  { %v203_v43 = vadd.f32 %v201_v42, %v193_v41 }
 0x47b   :  { %976 = vtanh.f32 %v203_v43 }
 0x488   :  { %v977_v44 = vpop.eup %976 }
 0x489   :  { %206 = vrot.lane.b32.xlu1 %v977_v44, %s1072_s20 }
 0x4fb   :  { %v207_v45 = vpop.permute.xlu1 %206 }
 0x4fc   :  { %v209_v46 = vmul.f32 %v975_v38, %v207_v45 }
 0x4fe   :  { %v1162_v47 = vpack.c.bf16 %v209_v46, %v209_v46 }
 0x500   :  { %233 = vrot.lane.b32.xlu0 %v1162_v47, %s1073_s21 }
 0x572   :  { %v234_v48 = vpop.permute.xlu0 %233 }
 0x573   :  { %909 = vmatmul.mubr.msk.bf16.vlgmr.msra.gmra.mxu0 %vm44_vm2, %v234_v48 }
 0x574   :  { %921 = vmatpush3.bf16.msra.mxu0 %v1106_v0  ;;  %924 = vmatprep.mubr.msk.bf16.mxu0 %vm1071_vm0, %v1070_v1 }
 0x575   :  { %922 = vmatprep.subr.bf16.mxu0 %v1070_v1 }
 0x578   :  { %923 = vmatpush3.bf16.msra.mxu0 %v1114_v2 }
 0x579   :  { %936 = vmatprep.subr.bf16.mxu0 %v1070_v1 }
 0x633   :  { %v272_v50 = vpop.f32.mrf.mxu0 }
 0x634   :  { %v278_v51 = vadd.f32 %v840_v49, %v272_v50 }
 0x635   :  { %v910_v52 = vpop.f32.mrf.mxu0 }
 0x636   :  { %978 = vtanh.f32 %v278_v51  ;;  %v842_v56 = vmul.f32 -1.442695, %v278_v51 }
 0x637   :  { %v275_v53 = vpop.f32.mrf.mxu0 }
 0x638   :  { %980 = vpow2.f32 %v842_v56  ;;  %v852_v53 = vld [vmem:[%s1306_s0 + $0xa] sm:$0x3] }
 0x639   :  { %v911_v54 = vpop.f32.mrf.mxu0 }
 0x643   :  { %v979_v55 = vpop.eup %978 }
 0x644   :  { %288 = vrot.lane.b32.xlu1 %v979_v55, %s1072_s20 }
 0x645   :  { %v981_v57 = vpop.eup %980 }
 0x646   :  { %v282_v58 = vadd.f32 1.0, %v981_v57 }
 0x648   :  { %982 = vrcp.f32 %v282_v58 }
 0x655   :  { %v983_v59 = vpop.eup %982 }
 0x656   :  { %v286_v62 = vmul.f32 %v983_v59, %v203_v43 }
 0x6b6   :  { %v289_v60 = vpop.permute.xlu1 %288 }
 0x6b7   :  { %v291_v61 = vmul.f32 %v983_v59, %v289_v60 }
 0x6b9   :  { %293 = vrot.lane.b32.xlu0 %v291_v61, %s1073_s21 }
 0x72b   :  { %v294_v63 = vpop.permute.xlu0 %293 }
 0x72c   :  { %v296_v3 = vadd.f32 %v294_v63, %v286_v62 }
 0x72e   :  { %984 = vtanh.f32 %v296_v3 }
 0x73b   :  { %v985_v4 = vpop.eup %984 }
 0x73c   :  { %299 = vrot.lane.b32.xlu1 %v985_v4, %s1072_s20 }
 0x7ae   :  { %v300_v5 = vpop.permute.xlu1 %299 }
 0x7af   :  { %v302_v6 = vmul.f32 %v983_v59, %v300_v5 }
 0x7b1   :  { %v1179_v7 = vpack.c.bf16 %v302_v6, %v302_v6 }
 0x7b3   :  { %326 = vrot.lane.b32.xlu0 %v1179_v7, %s1073_s21 }
 0x825   :  { %v327_v8 = vpop.permute.xlu0 %326 }
 0x826   :  { %917 = vmatmul.mubr.msk.bf16.vlgmr.msra.gmra.mxu1 %vm44_vm2, %v327_v8 }
 0x827   :  { %929 = vmatpush3.bf16.msra.mxu1 %v1106_v0  ;;  %932 = vmatprep.mubr.msk.bf16.mxu1 %vm1071_vm0, %v1070_v1 }
 0x828   :  { %930 = vmatprep.subr.bf16.mxu1 %v1070_v1 }
 0x82b   :  { %931 = vmatpush3.bf16.msra.mxu1 %v1114_v2 }
 0x82c   :  { %944 = vmatprep.subr.bf16.mxu1 %v1070_v1 }
 0x8e6   :  { %v365_v10 = vpop.f32.mrf.mxu1 }
 0x8e7   :  { %v371_v11 = vadd.f32 %v844_v9, %v365_v10 }
 0x8e8   :  { %v918_v12 = vpop.f32.mrf.mxu1 }
 0x8e9   :  { %986 = vtanh.f32 %v371_v11  ;;  %v846_v16 = vmul.f32 -1.442695, %v371_v11  ;;  %v856_v11 = vld [vmem:[%s1306_s0 + $0xc] sm:$0x3] }
 0x8ea   :  { %v368_v13 = vpop.f32.mrf.mxu1 }
 0x8eb   :  { %988 = vpow2.f32 %v846_v16 }
 0x8ec   :  { %v919_v14 = vpop.f32.mrf.mxu1 }
 0x8f6   :  { %v987_v15 = vpop.eup %986 }
 0x8f7   :  { %381 = vrot.lane.b32.xlu1 %v987_v15, %s1072_s20 }
 0x8f8   :  { %v989_v17 = vpop.eup %988 }
 0x8f9   :  { %v375_v18 = vadd.f32 1.0, %v989_v17 }
 0x8fb   :  { %990 = vrcp.f32 %v375_v18 }
 0x908   :  { %v991_v19 = vpop.eup %990 }
 0x909   :  { %v379_v22 = vmul.f32 %v991_v19, %v296_v3 }
 0x969   :  { %v382_v20 = vpop.permute.xlu1 %381 }
 0x96a   :  { %v384_v21 = vmul.f32 %v991_v19, %v382_v20 }
 0x96c   :  { %386 = vrot.lane.b32.xlu0 %v384_v21, %s1073_s21 }
 0x9de   :  { %v387_v23 = vpop.permute.xlu0 %386 }
 0x9df   :  { %v389_v24 = vadd.f32 %v387_v23, %v379_v22 }
 0x9e1   :  { %992 = vtanh.f32 %v389_v24 }
 0x9ee   :  { %v993_v25 = vpop.eup %992 }
 0x9ef   :  { %392 = vrot.lane.b32.xlu1 %v993_v25, %s1072_s20 }
 0xa61   :  { %v393_v27 = vpop.permute.xlu1 %392 }
 0xa62   :  { %v395_v28 = vmul.f32 %v991_v19, %v393_v27 }
 0xa64   :  { %v1196_v29 = vpack.c.bf16 %v395_v28, %v395_v28 }
 0xa66   :  { %419 = vrot.lane.b32.xlu0 %v1196_v29, %s1073_s21 }
 0xad8   :  { %v420_v30 = vpop.permute.xlu0 %419 }
 0xad9   :  { %925 = vmatmul.mubr.msk.bf16.vlgmr.msra.gmra.mxu0 %vm44_vm2, %v420_v30 }
 0xada   :  { %937 = vmatpush3.bf16.msra.mxu0 %v1106_v0  ;;  %940 = vmatprep.mubr.msk.bf16.mxu0 %vm1071_vm0, %v1070_v1 }
 0xadb   :  { %938 = vmatprep.subr.bf16.mxu0 %v1070_v1 }
 0xade   :  { %939 = vmatpush3.bf16.msra.mxu0 %v1114_v2 }
 0xb99   :  { %v458_v32 = vpop.f32.mrf.mxu0 }
 0xb9a   :  { %v464_v33 = vadd.f32 %v848_v31, %v458_v32 }
 0xb9b   :  { %v926_v34 = vpop.f32.mrf.mxu0 }
 0xb9c   :  { %994 = vtanh.f32 %v464_v33  ;;  %v850_v38 = vmul.f32 -1.442695, %v464_v33  ;;  %v860_v34 = vld [vmem:[%s1306_s0 + $0xe] sm:$0x3] }
 0xb9d   :  { %v461_v35 = vpop.f32.mrf.mxu0 }
 0xb9e   :  { %996 = vpow2.f32 %v850_v38 }
 0xb9f   :  { %v927_v36 = vpop.f32.mrf.mxu0 }
 0xba9   :  { %v995_v37 = vpop.eup %994 }
 0xbaa   :  { %474 = vrot.lane.b32.xlu1 %v995_v37, %s1072_s20 }
 0xbab   :  { %v997_v39 = vpop.eup %996 }
 0xbac   :  { %v468_v40 = vadd.f32 1.0, %v997_v39 }
 0xbae   :  { %998 = vrcp.f32 %v468_v40 }
 0xbbb   :  { %v999_v41 = vpop.eup %998 }
 0xbbc   :  { %v472_v44 = vmul.f32 %v999_v41, %v389_v24 }
 0xc1c   :  { %v475_v42 = vpop.permute.xlu1 %474 }
 0xc1d   :  { %v477_v43 = vmul.f32 %v999_v41, %v475_v42 }
 0xc1f   :  { %479 = vrot.lane.b32.xlu0 %v477_v43, %s1073_s21 }
 0xc91   :  { %v480_v45 = vpop.permute.xlu0 %479 }
 0xc92   :  { %v482_v46 = vadd.f32 %v480_v45, %v472_v44  ;;  %v1074_v44 = vmov 1966171168  }
 0xc93   :  { %v120_v45 = vunpack.c.l.s4 %v1074_v44 }
 0xc94   :  { %1000 = vtanh.f32 %v482_v46 }
 0xca1   :  { %v1001_v48 = vpop.eup %1000 }
 0xca2   :  { %485 = vrot.lane.b32.xlu1 %v1001_v48, %s1072_s20  ;;  %v121_v48 = vunpack.c.0.s8 %v120_v45 }
 0xd14   :  { %v486_v49 = vpop.permute.xlu1 %485 }
 0xd15   :  { %v488_v50 = vmul.f32 %v999_v41, %v486_v49 }
 0xd17   :  { %v1212_v51 = vpack.c.bf16 %v488_v50, %v488_v50 }
 0xd19   :  { %512 = vrot.lane.b32.xlu0 %v1212_v51, %s1073_s21 }
 0xd8b   :  { %v513_v52 = vpop.permute.xlu0 %512 }
 0xd8c   :  { %933 = vmatmul.mubr.msk.bf16.vlgmr.msra.gmra.mxu1 %vm44_vm2, %v513_v52 }
 0xd8d   :  { %945 = vmatpush3.bf16.msra.mxu1 %v1106_v0  ;;  %948 = vmatprep.mubr.msk.bf16.mxu1 %vm1071_vm0, %v1070_v1 }
 0xd8e   :  { %946 = vmatprep.subr.bf16.mxu1 %v1070_v1 }
 0xd91   :  { %947 = vmatpush3.bf16.msra.mxu1 %v1114_v2 }
 0xe4c   :  { %v551_v54 = vpop.f32.mrf.mxu1 }
 0xe4d   :  { %v557_v55 = vadd.f32 %v852_v53, %v551_v54 }
 0xe4e   :  { %v934_v56 = vpop.f32.mrf.mxu1 }
 0xe4f   :  { %1002 = vtanh.f32 %v557_v55  ;;  %v854_v0 = vmul.f32 -1.442695, %v557_v55 }
 0xe50   :  { %v554_v57 = vpop.f32.mrf.mxu1 }
 0xe51   :  { %1004 = vpow2.f32 %v854_v0 }
 0xe52   :  { %v935_v58 = vpop.f32.mrf.mxu1 }
 0xe5c   :  { %v1003_v59 = vpop.eup %1002 }
 0xe5d   :  { %567 = vrot.lane.b32.xlu1 %v1003_v59, %s1072_s20 }
 0xe5e   :  { %v1005_v60 = vpop.eup %1004 }
 0xe5f   :  { %v561_v61 = vadd.f32 1.0, %v1005_v60 }
 0xe61   :  { %1006 = vrcp.f32 %v561_v61 }
 0xe6e   :  { %v1007_v1 = vpop.eup %1006 }
 0xe6f   :  { %v565_v63 = vmul.f32 %v1007_v1, %v482_v46  ;;  %v122_v46 = vlaneseq }
 0xe71   :  { %v123_v49 = vshrl.u32 %v122_v46, 7 }
 0xe73   :  { %v124_v50 = vsub.s32 %v121_v48, %v123_v49 }
 0xe75   :  { %v125_v54 = vrot.slane %v1145_v26, %v124_v50  ;;  %v311_v56 = vrot.slane %v1179_v7, %v124_v50  ;;  %v497_v58 = vrot.slane %v1212_v51, %v124_v50 }
 0xe77   :  { %v132_v57 = vrot.slane %v125_v54, %v124_v50  ;;  %v318_v59 = vrot.slane %v311_v56, %v124_v50  ;;  %v504_v0 = vrot.slane %v497_v58, %v124_v50 }
 0xecf   :  { %v568_v2 = vpop.permute.xlu1 %567 }
 0xed0   :  { %v570_v62 = vmul.f32 %v1007_v1, %v568_v2 }
 0xed2   :  { %572 = vrot.lane.b32.xlu0 %v570_v62, %s1073_s21  ;;  %v218_v62 = vrot.slane %v1162_v47, %v124_v50 }
 0xf44   :  { %v573_v3 = vpop.permute.xlu0 %572 }
 0xf45   :  { %v575_v4 = vadd.f32 %v573_v3, %v565_v63  ;;  %v404_v63 = vrot.slane %v1196_v29, %v124_v50  ;;  %v225_v3 = vrot.slane %v218_v62, %v124_v50 }
 0xf47   :  { %1008 = vtanh.f32 %v575_v4 }
 0xf54   :  { %v1009_v5 = vpop.eup %1008 }
 0xf55   :  { %578 = vrot.lane.b32.xlu1 %v1009_v5, %s1072_s20  ;;  %v411_v5 = vrot.slane %v404_v63, %v124_v50 }
 0xfc7   :  { %v579_v6 = vpop.permute.xlu1 %578 }
 0xfc8   :  { %v581_v8 = vmul.f32 %v1007_v1, %v579_v6 }
 0xfca   :  { %v1228_v9 = vpack.c.bf16 %v581_v8, %v581_v8 }
 0xfcc   :  { %605 = vrot.lane.b32.xlu0 %v1228_v9, %s1073_s21 }
0x103e   :  { %v606_v10 = vpop.permute.xlu0 %605 }
0x103f   :  { %941 = vmatmul.mubr.msk.bf16.vlgmr.msra.gmra.mxu0 %vm44_vm2, %v606_v10 }
0x10ff   :  { %v644_v12 = vpop.f32.mrf.mxu0 }
0x1100   :  { %v650_v13 = vadd.f32 %v856_v11, %v644_v12 }
0x1101   :  { %v942_v14 = vpop.f32.mrf.mxu0 }
0x1102   :  { %1010 = vtanh.f32 %v650_v13  ;;  %v858_v18 = vmul.f32 -1.442695, %v650_v13 }
0x1103   :  { %v647_v15 = vpop.f32.mrf.mxu0 }
0x1104   :  { %1012 = vpow2.f32 %v858_v18 }
0x1105   :  { %v943_v16 = vpop.f32.mrf.mxu0 }
0x110f   :  { %v1011_v17 = vpop.eup %1010 }
0x1110   :  { %660 = vrot.lane.b32.xlu1 %v1011_v17, %s1072_s20 }
0x1111   :  { %v1013_v19 = vpop.eup %1012 }
0x1112   :  { %v654_v20 = vadd.f32 1.0, %v1013_v19 }
0x1114   :  { %1014 = vrcp.f32 %v654_v20 }
0x1121   :  { %v1015_v21 = vpop.eup %1014 }
0x1122   :  { %v658_v24 = vmul.f32 %v1015_v21, %v575_v4  ;;  %v590_v4 = vrot.slane %v1228_v9, %v124_v50 }
0x1124   :  { %v597_v6 = vrot.slane %v590_v4, %v124_v50 }
0x1182   :  { %v661_v22 = vpop.permute.xlu1 %660 }
0x1183   :  { %v663_v23 = vmul.f32 %v1015_v21, %v661_v22 }
0x1185   :  { %665 = vrot.lane.b32.xlu0 %v663_v23, %s1073_s21 }
0x11f7   :  { %v666_v25 = vpop.permute.xlu0 %665 }
0x11f8   :  { %v668_v27 = vadd.f32 %v666_v25, %v658_v24 }
0x11fa   :  { %1016 = vtanh.f32 %v668_v27 }
0x1207   :  { %v1017_v28 = vpop.eup %1016 }
0x1208   :  { %671 = vrot.lane.b32.xlu1 %v1017_v28, %s1072_s20 }
0x127a   :  { %v672_v30 = vpop.permute.xlu1 %671 }
0x127b   :  { %v674_v31 = vmul.f32 %v1015_v21, %v672_v30 }
0x127d   :  { %v1239_v32 = vpack.c.bf16 %v674_v31, %v674_v31 }
0x127f   :  { %698 = vrot.lane.b32.xlu0 %v1239_v32, %s1073_s21  ;;  %v683_v47 = vrot.slane %v1239_v32, %v124_v50 }
0x1281   :  { %v690_v9 = vrot.slane %v683_v47, %v124_v50 }
0x12f1   :  { %v699_v33 = vpop.permute.xlu0 %698 }
0x12f2   :  { %949 = vmatmul.mubr.msk.bf16.vlgmr.msra.gmra.mxu1 %vm44_vm2, %v699_v33 }
0x13b2   :  { %v737_v35 = vpop.f32.mrf.mxu1 }
0x13b3   :  { %v743_v36 = vadd.f32 %v860_v34, %v737_v35 }
0x13b4   :  { %v950_v37 = vpop.f32.mrf.mxu1 }
0x13b5   :  { %1018 = vtanh.f32 %v743_v36  ;;  %v862_v41 = vmul.f32 -1.442695, %v743_v36 }
0x13b6   :  { %v740_v38 = vpop.f32.mrf.mxu1 }
0x13b7   :  { %1020 = vpow2.f32 %v862_v41 }
0x13b8   :  { %v951_v39 = vpop.f32.mrf.mxu1 }
0x13c2   :  { %v1019_v40 = vpop.eup %1018 }
0x13c3   :  { %753 = vrot.lane.b32.xlu1 %v1019_v40, %s1072_s20 }
0x13c4   :  { %v1021_v42 = vpop.eup %1020 }
0x13c5   :  { %v747_v43 = vadd.f32 1.0, %v1021_v42 }
0x13c7   :  { %1022 = vrcp.f32 %v747_v43 }
0x13d4   :  { %v1023_v52 = vpop.eup %1022 }
0x13d5   :  { %v751_v60 = vmul.f32 %v1023_v52, %v668_v27 }
0x1435   :  { %v754_v53 = vpop.permute.xlu1 %753 }
0x1436   :  { %v756_v55 = vmul.f32 %v1023_v52, %v754_v53 }
0x1438   :  { %758 = vrot.lane.b32.xlu0 %v756_v55, %s1073_s21 }
0x143c   :  { %133 = vrot.lane.b32.xlu0 %v132_v57, %s1073_s21 }
0x1440   :  { %319 = vrot.lane.b32.xlu0 %v318_v59, %s1073_s21 }
0x1444   :  { %505 = vrot.lane.b32.xlu0 %v504_v0, %s1073_s21 }
0x14aa   :  { %v759_v61 = vpop.permute.xlu0 %758 }
0x14ab   :  { %v761_v1 = vadd.f32 %v759_v61, %v751_v60 }
0x14ad   :  { %1024 = vtanh.f32 %v761_v1 }
0x14ae   :  { %v134_v26 = vpop.permute.xlu0 %133 }
0x14af   :  { %137 = vst.msk [vmem:[%s1308_s2] sm:$0x1] %vm136_vm3, %v134_v26 }
0x14b2   :  { %v320_v7 = vpop.permute.xlu0 %319 }
0x14b3   :  { %843 = vst.msk [vmem:[%s1308_s2 + $0x2] sm:$0x1] %vm136_vm3, %v320_v7 }
0x14b6   :  { %v506_v51 = vpop.permute.xlu0 %505 }
0x14b7   :  { %851 = vst.msk [vmem:[%s1308_s2 + $0x4] sm:$0x1] %vm136_vm3, %v506_v51 }
0x14ba   :  { %v1025_v2 = vpop.eup %1024 }
0x14bb   :  { %764 = vrot.lane.b32.xlu1 %v1025_v2, %s1072_s20 }
0x14bf   :  { %796 = vrot.lane.b32.xlu1 %v761_v1, %s1075_s15 }
0x14c3   :  { %226 = vrot.lane.b32.xlu1 %v225_v3, %s1073_s21 }
0x14c7   :  { %412 = vrot.lane.b32.xlu1 %v411_v5, %s1073_s21 }
0x14cb   :  { %598 = vrot.lane.b32.xlu1 %v597_v6, %s1073_s21 }
0x152d   :  { %v765_v8 = vpop.permute.xlu1 %764 }
0x152e   :  { %v767_v10 = vmul.f32 %v1023_v52, %v765_v8 }
0x1530   :  { %v768_v11 = vpack.c.bf16 %v767_v10, %v767_v10  ;;  %790 = vrot.lane.b32.xlu0 %v767_v10, %s1073_s21 }
0x1531   :  { %v797_v29 = vpop.permute.xlu1 %796 }
0x1532   :  { %v776_v12 = vrot.slane %v768_v11, %v124_v50  ;;  %799 = vst.msk [vmem:[#allocation4] sm:$0x3] %vm21_vm1, %v797_v29 }
0x1533   :  { %1037 = shalt.err (!%p1034_p4)
}
0x1534   :  { %821 = dma.vmem_to_hbm [thread:$0]  %s819_s17, 32, %s1310_s4, [#allocation5]   ;;  %691 = vrot.lane.b32.xlu0 %v690_v9, %s1073_s21  ;;  %v783_v13 = vrot.slane %v776_v12, %v124_v50 }
0x1535   :  { %v227_v14 = vpop.permute.xlu1 %226  ;;  %s1077_s26 = smov [#allocation2]  }
0x1536   :  { %839 = vst.msk [vmem:[%s1308_s2 + $0x1] sm:$0x1] %vm136_vm3, %v227_v14  ;;  %784 = vrot.lane.b32.xlu1 %v783_v13, %s1073_s21  ;;  %s808_s27 = sshll.u32 %s1077_s26, 4  ;;  %s809_s27 = int_to_ptr.vmem [resolvable:$true] %s808_s27 }
0x1537   :  { %s1046_s28 = scalar_lea.vmem %s809_s27, 32  ;;  %p1051_p6 = scmp.lt.s32.totalorder %s809_s27, %s809_s27 }
0x1538   :  { %p1047_p5 = scmp.ne.s32.totalorder %s809_s27, %s1046_s28  ;;  %p1052_p7 = scmp.lt.s32.totalorder %s1046_s28, %s1046_s28 }
0x1539   :  { %v413_v15 = vpop.permute.xlu1 %412 }
0x153a   :  { %847 = vst.msk [vmem:[%s1308_s2 + $0x3] sm:$0x1] %vm136_vm3, %v413_v15  ;;  %p1053_p8 = por %p1052_p7, %p1051_p6 }
0x153c   :  { %p1054_p9 = pnand %p1053_p8, %p1047_p5 }
0x153d   :  { %v599_v16 = vpop.permute.xlu1 %598 }
0x153e   :  { %855 = vst.msk [vmem:[%s1308_s2 + $0x5] sm:$0x1] %vm136_vm3, %v599_v16 }
0x15a2   :  { %v791_v17 = vpop.permute.xlu0 %790 }
0x15a3   :  { %794 = vst.msk [vmem:[#allocation2] sm:$0x3] %vm21_vm1, %v791_v17 }
0x15a4   :  { %1057 = shalt.err (!%p1054_p9)
}
0x15a5   :  { %811 = dma.vmem_to_hbm [thread:$0]  %s809_s27, 32, %s1309_s3, [#allocation3]  }
0x15a6   :  { %v692_v18 = vpop.permute.xlu0 %691 }
0x15a7   :  { %859 = vst.msk [vmem:[%s1308_s2 + $0x6] sm:$0x1] %vm136_vm3, %v692_v18 }
0x15a8   :  { %v785_v19 = vpop.permute.xlu1 %784 }
0x15a9   :  { %863 = vst.msk [vmem:[%s1308_s2 + $0x7] sm:$0x1] %vm136_vm3, %v785_v19 }
0x15aa   :  { %1066 = dma.done.wait [#allocation3], 32  }
0x15ab   :  { %1067 = vsyncadd [#allocation3], 4294967264 }
0x15ac   :  { %1068 = dma.done.wait [#allocation5], 32  }
0x15ad   :  { %1069 = vsyncadd [#allocation5], 4294967264 }
0x15ae   :  { %830 = vsyncpa [#allocation3], 1 }
0x15af   :  { %831 = vsyncpa [#allocation5], 1 }

</bundles_post_ra>
